<compile_context>
chip_gen: v7x
topology: tpu7x:2x2x1
jax: 0.10.0
libtpu: 0.0.40
codegen_flags: <defaults>
</compile_context>

<pallas_src>
import functools

import jax
import jax.numpy as jnp
from jax.experimental import pallas as pl
from jax.experimental.pallas import tpu as pltpu


def _round_up(x, m):
    return ((x + m - 1) // m) * m


def _elu_kernel(x):
    # ELU(alpha=1). exp(x)-1 instead of expm1 inside the kernel: guaranteed
    # Mosaic lowering; cancellation near 0- is ~1e-7 abs (f32), well in tol.
    one = jnp.asarray(1.0, x.dtype)
    return jnp.where(x > 0, x, jnp.exp(x) - one)


def _elu_ref(x):
    return jnp.where(x > 0, x, jnp.expm1(x))


# ----------------------------------------------------------------------------
# Kernel
# ----------------------------------------------------------------------------
def deep_irl_fc_kernel(x_ref, w1_ref, b1_ref, w2_ref, b2_ref, w3_ref, b3_ref,
                       o_ref, *, bf16_elu):
    # x_ref : (n_input, TN) bf16   batch on lanes
    # w1_ref: (H1, n_input) bf16   PyTorch-native [out, in], zero padded
    # b1_ref: (H1, 1)       f32
    # w2_ref: (H2, H1)      bf16
    # b2_ref: (H2, 1)       f32
    # w3_ref: (H2, 1)       f32    reward-layer weights as a column
    # b3_ref: (1, 1)        f32    scalar in SMEM
    # o_ref : (1, TN)       f32    lane-dense output row
    h1 = jnp.dot(w1_ref[...], x_ref[...],
                 preferred_element_type=jnp.float32) + b1_ref[...]
    if bf16_elu:
        # v6e/v7x: bf16 EUP/VPU path (~2x f32 rate). h1 is cast to bf16 for the
        # second matmul anyway, so no extra precision loss vs the f32-ELU path.
        h1 = _elu_kernel(h1.astype(jnp.bfloat16))          # (H1, TN) bf16
    else:
        # v5e: no bf16 VPU/EUP -> keep ELU in f32, cast only for the MXU.
        h1 = _elu_kernel(h1).astype(jnp.bfloat16)          # (H1, TN) bf16
    h2 = jnp.dot(w2_ref[...], h1,
                 preferred_element_type=jnp.float32) + b2_ref[...]
    h2 = _elu_kernel(h2)                                   # (H2, TN) f32
    # 300->1 reward layer on VPU (broadcast mul) + XLU (sublane reduce):
    # avoids a width-1 MXU matmul that would use ~1/256 of the array.
    r = jnp.sum(h2 * w3_ref[...], axis=0, keepdims=True) + b3_ref[0, 0]
    o_ref[...] = r.astype(o_ref.dtype)                     # (1, TN)


# ----------------------------------------------------------------------------
# Parameter packing (done ONCE per set of weights)
# ----------------------------------------------------------------------------
def pack_params(params, *, sublane=16):
    """Zero-pad hidden dims only to the sublane quantum (NOT 128), cast the
    MXU operands to bf16.  Padding is exact: padded rows get bias 0 ->
    ELU(0) = 0 -> multiplied by zero w3/w2 entries -> contribute nothing."""
    w1, b1, w2, b2, w3, b3 = params            # PyTorch-native [out, in]
    n_h1, n_in = w1.shape
    n_h2 = w2.shape[0]
    H1 = _round_up(n_h1, sublane)              # 400 -> 400   (was 512)
    H2 = _round_up(n_h2, sublane)              # 300 -> 304   (was 384)
    w1p = jnp.zeros((H1, n_in), jnp.float32).at[:n_h1, :].set(w1).astype(jnp.bfloat16)
    b1p = jnp.zeros((H1, 1), jnp.float32).at[:n_h1, 0].set(b1)
    w2p = jnp.zeros((H2, H1), jnp.float32).at[:n_h2, :n_h1].set(w2).astype(jnp.bfloat16)
    b2p = jnp.zeros((H2, 1), jnp.float32).at[:n_h2, 0].set(b2)
    w3p = jnp.zeros((H2, 1), jnp.float32).at[:n_h2, 0].set(w3[0])
    b3p = jnp.asarray(b3, jnp.float32).reshape(1, 1)
    return (w1p, b1p, w2p, b2p, w3p, b3p)


def _pick_tile_n(n, max_tile=1024):
    """Largest batch tile (multiple of 128, <= max_tile) that keeps the grid
    length >= 2 (v7x megacore) while amortizing per-grid-step overhead."""
    n128 = _round_up(max(n, 1), 128)
    if n128 <= 256:
        return 128
    half = _round_up((n128 + 1) // 2, 128)     # ~half the padded batch
    return min(max_tile, half)


def _supports_bf16_elu():
    """bf16 VPU/EUP exists on v6e/v7x; keep f32 ELU on v5e and older."""
    try:
        kind = jax.devices()[0].device_kind.lower()
    except Exception:
        return False
    return ("v6" in kind) or ("v7" in kind)


# ----------------------------------------------------------------------------
# Forward factory: pack once, return a jitted closure
# ----------------------------------------------------------------------------
def make_deep_irl_fc_forward(params, *, max_tile=1024, bf16_elu=None):
    """Packs the weights ONCE (zero-pad + bf16 cast) and returns a jitted
    states[N, n_input] f32 -> rewards[N, 1] f32 forward pass."""
    packed = pack_params(params)
    w1p, b1p, w2p, b2p, w3p, b3p = packed
    H1, n_in = w1p.shape
    H2 = w2p.shape[0]
    if bf16_elu is None:
        bf16_elu = _supports_bf16_elu()
    kernel = functools.partial(deep_irl_fc_kernel, bf16_elu=bf16_elu)
    weight_bytes = sum(int(a.size) * a.dtype.itemsize for a in packed)

    @jax.jit
    def forward(states):
        states = jnp.asarray(states, jnp.float32)
        N = states.shape[0]
        assert states.shape[1] == n_in
        tile_n = _pick_tile_n(N, max_tile)
        n_p = _round_up(N, tile_n)             # pad batch -> any N works

        # Batch-on-lanes layout. Transpose + pad materialized in bf16 (half the
        # bytes of an f32 pass), fused with the cast under this jit.
        # TODO(synk): feed (N, n_in) directly and transpose the narrow bf16
        # tile in-kernel (XLU slot is idle) once that lowering is validated.
        x_t = jnp.zeros((n_in, n_p), jnp.bfloat16).at[:, :N].set(
            states.T.astype(jnp.bfloat16))

        grid = (n_p // tile_n,)
        # Resident blocks: constant index map -> stay in VMEM across all tiles.
        # TODO(synk): pipeline_mode=pl.Buffered(1) on these for v7x tile_n>=4096.
        resident = lambda a: pl.BlockSpec(a.shape, lambda i: (0, 0))

        cost = pl.CostEstimate(
            flops=2 * (H1 * n_in + H2 * H1 + H2) * n_p,
            transcendentals=(H1 + H2) * n_p,
            bytes_accessed=int(x_t.size) * 2 + weight_bytes + n_p * 4,
        )

        out = pl.pallas_call(
            kernel,
            out_shape=jax.ShapeDtypeStruct((1, n_p), jnp.float32),
            grid_spec=pltpu.PrefetchScalarGridSpec(
                num_scalar_prefetch=0,
                grid=grid,
                in_specs=[
                    pl.BlockSpec((n_in, tile_n), lambda i: (0, i)),     # batch tile
                    resident(w1p),
                    resident(b1p),
                    resident(w2p),
                    resident(b2p),
                    resident(w3p),
                    pl.BlockSpec(memory_space=pltpu.MemorySpace.SMEM),  # b3 scalar
                ],
                out_specs=pl.BlockSpec((1, tile_n), lambda i: (0, i)),  # lane-dense
            ),
            compiler_params=pltpu.CompilerParams(
                dimension_semantics=("parallel",)),
            cost_estimate=cost,
        )(x_t, w1p, b1p, w2p, b2p, w3p, b3p)

        return out[0, :N].reshape(N, 1)

    return forward


# ----------------------------------------------------------------------------
# Init + references
# ----------------------------------------------------------------------------
def init_params(key, n_input, n_h1=400, n_h2=300):
    """PyTorch nn.Linear-style init, PyTorch-native [out_features, in_features]."""
    ks = jax.random.split(key, 6)

    def lin(kw, kb, fan_in, fan_out):
        bound = 1.0 / jnp.sqrt(jnp.float32(fan_in))
        w = jax.random.uniform(kw, (fan_out, fan_in), jnp.float32, -bound, bound)
        b = jax.random.uniform(kb, (fan_out,), jnp.float32, -bound, bound)
        return w, b

    w1, b1 = lin(ks[0], ks[1], n_input, n_h1)
    w2, b2 = lin(ks[2], ks[3], n_h1, n_h2)
    w3, b3 = lin(ks[4], ks[5], n_h2, 1)
    return (w1, b1, w2, b2, w3, b3)


def reference_forward(states, params):
    """Pure f32 reference (matches the PyTorch module exactly)."""
    w1, b1, w2, b2, w3, b3 = params
    h1 = _elu_ref(states @ w1.T + b1)
    h2 = _elu_ref(h1 @ w2.T + b2)
    return h2 @ w3.T + b3


def reference_forward_kernel_precision(states, params, *, bf16_elu):
    """Emulates the kernel's precision (bf16 MXU operands, f32 accumulation,
    optional bf16 ELU on h1)."""
    w1, b1, w2, b2, w3, b3 = params
    x = states.astype(jnp.bfloat16)
    h1 = jnp.dot(x, w1.T.astype(jnp.bfloat16),
                 preferred_element_type=jnp.float32) + b1
    if bf16_elu:
        h1 = _elu_kernel(h1.astype(jnp.bfloat16))
    else:
        h1 = _elu_kernel(h1).astype(jnp.bfloat16)
    h2 = _elu_kernel(jnp.dot(h1, w2.T.astype(jnp.bfloat16),
                             preferred_element_type=jnp.float32) + b2)
    return jnp.dot(h2, w3.T, preferred_element_type=jnp.float32) + b3


if __name__ == "__main__":
    key = jax.random.PRNGKey(0)
    k_x, k_p = jax.random.split(key)

    # e.g. a 16x16 gridworld flattened: 256 states, 16 features per state
    n_states, n_input = 256, 16
    states = jax.random.normal(k_x, (n_states, n_input), jnp.float32)
    params = init_params(k_p, n_input, n_h1=400, n_h2=300)

    bf16_elu = _supports_bf16_elu()
    forward = make_deep_irl_fc_forward(params, max_tile=1024, bf16_elu=bf16_elu)

    rewards = jax.block_until_ready(forward(states))     # grid = 2 x 128-lane tiles
    assert rewards.shape == (n_states, 1)

    ref_kp = reference_forward_kernel_precision(states, params, bf16_elu=bf16_elu)
    ref_f32 = reference_forward(states, params)
    assert jnp.allclose(rewards, ref_kp, atol=5e-3, rtol=5e-3), \
        "mismatch vs kernel-precision reference"
    assert jnp.allclose(rewards, ref_f32, atol=5e-2, rtol=5e-2), \
        "mismatch vs f32 reference"

    print("KERNEL_OK")
</pallas_src>

<mosaic_0001>
module attributes {stable_mosaic.version = 11 : i64} {
  func.func @deep_irl_fc_kernel(%arg0: i32, %arg1: memref<16x128xbf16, #tpu.memory_space<vmem>>, %arg2: memref<400x16xbf16, #tpu.memory_space<vmem>>, %arg3: memref<400x1xf32, #tpu.memory_space<vmem>>, %arg4: memref<304x400xbf16, #tpu.memory_space<vmem>>, %arg5: memref<304x1xf32, #tpu.memory_space<vmem>>, %arg6: memref<304x1xf32, #tpu.memory_space<vmem>>, %arg7: memref<1x1xf32, #tpu.memory_space<smem>>, %arg8: memref<1x128xf32, #tpu.memory_space<vmem>>) attributes {dimension_semantics = [#tpu.dimension_semantics<parallel>], iteration_bounds = array<i64: 2>, scalar_prefetch = 0 : i64, scratch_operands = 0 : i64, tpu.core_type = #tpu.core_type<tc>, window_params = [{transform_indices = @transform_0, window_bounds = array<i64: 16, 128>}, {pipeline_mode = #tpu.pipeline_mode<synchronous>, transform_indices = @transform_1, window_bounds = array<i64: 400, 16>}, {pipeline_mode = #tpu.pipeline_mode<synchronous>, transform_indices = @transform_2, window_bounds = array<i64: 400, 1>}, {pipeline_mode = #tpu.pipeline_mode<synchronous>, transform_indices = @transform_3, window_bounds = array<i64: 304, 400>}, {pipeline_mode = #tpu.pipeline_mode<synchronous>, transform_indices = @transform_4, window_bounds = array<i64: 304, 1>}, {pipeline_mode = #tpu.pipeline_mode<synchronous>, transform_indices = @transform_5, window_bounds = array<i64: 304, 1>}, {transform_indices = @transform_6, window_bounds = array<i64: 1, 1>}, {transform_indices = @transform_7, window_bounds = array<i64: 1, 128>}]} {
    %c0 = arith.constant 0 : index
    %c0_0 = arith.constant 0 : index
    %0 = vector.load %arg2[%c0, %c0_0] : memref<400x16xbf16, #tpu.memory_space<vmem>>, vector<400x16xbf16>
    %c0_1 = arith.constant 0 : index
    %c0_2 = arith.constant 0 : index
    %1 = vector.load %arg1[%c0_1, %c0_2] : memref<16x128xbf16, #tpu.memory_space<vmem>>, vector<16x128xbf16>
    %cst = arith.constant dense<0.000000e+00> : vector<400x128xf32>
    %2 = tpu.matmul %0, %1, %cst {dimension_numbers = #tpu.dot_dimension_numbers<[1], [0], [0], [1], [0, 0, 1, 1], [], []>} : vector<400x16xbf16>, vector<16x128xbf16>, vector<400x128xf32> -> vector<400x128xf32>
    %c0_3 = arith.constant 0 : index
    %c0_4 = arith.constant 0 : index
    %3 = vector.load %arg3[%c0_3, %c0_4] : memref<400x1xf32, #tpu.memory_space<vmem>>, vector<400x1xf32>
    %4 = vector.broadcast %3 : vector<400x1xf32> to vector<400x128xf32>
    %5 = arith.addf %2, %4 : vector<400x128xf32>
    %cst_5 = arith.constant 0.000000e+00 : f32
    %6 = vector.broadcast %cst_5 : f32 to vector<400x128xf32>
    %7 = arith.cmpf ogt, %5, %6 : vector<400x128xf32>
    %8 = math.exp %5 : vector<400x128xf32>
    %cst_6 = arith.constant 1.000000e+00 : f32
    %9 = vector.broadcast %cst_6 : f32 to vector<400x128xf32>
    %10 = arith.subf %8, %9 : vector<400x128xf32>
    %11 = arith.select %7, %5, %10 : vector<400x128xi1>, vector<400x128xf32>
    %12 = arith.truncf %11 : vector<400x128xf32> to vector<400x128xbf16>
    %c0_7 = arith.constant 0 : index
    %c0_8 = arith.constant 0 : index
    %13 = vector.load %arg4[%c0_7, %c0_8] : memref<304x400xbf16, #tpu.memory_space<vmem>>, vector<304x400xbf16>
    %cst_9 = arith.constant dense<0.000000e+00> : vector<304x128xf32>
    %14 = tpu.matmul %13, %12, %cst_9 {dimension_numbers = #tpu.dot_dimension_numbers<[1], [0], [0], [1], [0, 0, 1, 1], [], []>} : vector<304x400xbf16>, vector<400x128xbf16>, vector<304x128xf32> -> vector<304x128xf32>
    %c0_10 = arith.constant 0 : index
    %c0_11 = arith.constant 0 : index
    %15 = vector.load %arg5[%c0_10, %c0_11] : memref<304x1xf32, #tpu.memory_space<vmem>>, vector<304x1xf32>
    %16 = vector.broadcast %15 : vector<304x1xf32> to vector<304x128xf32>
    %17 = arith.addf %14, %16 : vector<304x128xf32>
    %cst_12 = arith.constant 0.000000e+00 : f32
    %18 = vector.broadcast %cst_12 : f32 to vector<304x128xf32>
    %19 = arith.cmpf ogt, %17, %18 : vector<304x128xf32>
    %20 = math.exp %17 : vector<304x128xf32>
    %cst_13 = arith.constant 1.000000e+00 : f32
    %21 = vector.broadcast %cst_13 : f32 to vector<304x128xf32>
    %22 = arith.subf %20, %21 : vector<304x128xf32>
    %23 = arith.select %19, %17, %22 : vector<304x128xi1>, vector<304x128xf32>
    %c0_14 = arith.constant 0 : index
    %c0_15 = arith.constant 0 : index
    %24 = vector.load %arg6[%c0_14, %c0_15] : memref<304x1xf32, #tpu.memory_space<vmem>>, vector<304x1xf32>
    %25 = vector.broadcast %24 : vector<304x1xf32> to vector<304x128xf32>
    %26 = arith.mulf %23, %25 : vector<304x128xf32>
    %cst_16 = arith.constant dense<0.000000e+00> : vector<128xf32>
    %27 = vector.multi_reduction <add>, %26, %cst_16 [0] : vector<304x128xf32> to vector<128xf32>
    %28 = vector.shape_cast %27 : vector<128xf32> to vector<1x128xf32>
    %c0_17 = arith.constant 0 : index
    %c0_18 = arith.constant 0 : index
    %29 = memref.load %arg7[%c0_17, %c0_18] : memref<1x1xf32, #tpu.memory_space<smem>>
    %30 = vector.broadcast %29 : f32 to vector<1x128xf32>
    %31 = arith.addf %28, %30 : vector<1x128xf32>
    %c0_19 = arith.constant 0 : index
    %c0_20 = arith.constant 0 : index
    %32 = vector.load %arg8[%c0_19, %c0_20] : memref<1x128xf32, #tpu.memory_space<vmem>>, vector<1x128xf32>
    tpu.vector_store %arg8[%c0_19, %c0_20], %31 {strides = array<i32>} : memref<1x128xf32, #tpu.memory_space<vmem>>, vector<1x128xf32>,
    return
  }
  func.func @transform_0(%arg0: i32) -> (i32, i32) {
    %c0_i32 = arith.constant 0 : i32
    %c0_i32_0 = arith.constant 0 : i32
    return %c0_i32, %arg0 : i32, i32
  }
  func.func @transform_1(%arg0: i32) -> (i32, i32) {
    %c0_i32 = arith.constant 0 : i32
    %c0_i32_0 = arith.constant 0 : i32
    %c0_i32_1 = arith.constant 0 : i32
    return %c0_i32, %c0_i32_0 : i32, i32
  }
  func.func @transform_2(%arg0: i32) -> (i32, i32) {
    %c0_i32 = arith.constant 0 : i32
    %c0_i32_0 = arith.constant 0 : i32
    %c0_i32_1 = arith.constant 0 : i32
    return %c0_i32, %c0_i32_0 : i32, i32
  }
  func.func @transform_3(%arg0: i32) -> (i32, i32) {
    %c0_i32 = arith.constant 0 : i32
    %c0_i32_0 = arith.constant 0 : i32
    %c0_i32_1 = arith.constant 0 : i32
    return %c0_i32, %c0_i32_0 : i32, i32
  }
  func.func @transform_4(%arg0: i32) -> (i32, i32) {
    %c0_i32 = arith.constant 0 : i32
    %c0_i32_0 = arith.constant 0 : i32
    %c0_i32_1 = arith.constant 0 : i32
    return %c0_i32, %c0_i32_0 : i32, i32
  }
  func.func @transform_5(%arg0: i32) -> (i32, i32) {
    %c0_i32 = arith.constant 0 : i32
    %c0_i32_0 = arith.constant 0 : i32
    %c0_i32_1 = arith.constant 0 : i32
    return %c0_i32, %c0_i32_0 : i32, i32
  }
  func.func @transform_6(%arg0: i32) -> (i32, i32) {
    %c0_i32 = arith.constant 0 : i32
    %c0_i32_0 = arith.constant 0 : i32
    %c0_i32_1 = arith.constant 0 : i32
    return %c0_i32, %c0_i32_0 : i32, i32
  }
  func.func @transform_7(%arg0: i32) -> (i32, i32) {
    %c0_i32 = arith.constant 0 : i32
    %c0_i32_0 = arith.constant 0 : i32
    return %c0_i32, %arg0 : i32, i32
  }
}

</mosaic_0001>

<bundles_post_ra>
// kernel: forward.1
= control target key start
LH: loop header
LB: loop body
LE: loop exit
PB: predicated region body
PF: predicated region fallthrough
CT: control target
= control target key end

     0   :  { %s5324_s0 = inlined_call_operand.vmem [shape: bf16[16,256], index: 0, kind: input, shape index: {}]   ;;  %s5325_s1 = inlined_call_operand.vmem [shape: bf16[400,16], index: 1, kind: input, shape index: {}]   ;;  %s5326_s2 = inlined_call_operand.vmem [shape: f32[400,1], index: 2, kind: input, shape index: {}]   ;;  %s5327_s3 = inlined_call_operand.vmem [shape: bf16[304,400], index: 3, kind: input, shape index: {}]   ;;  %s5328_s4 = inlined_call_operand.vmem [shape: f32[304,1], index: 4, kind: input, shape index: {}]   ;;  %s5329_s5 = inlined_call_operand.vmem [shape: f32[304,1], index: 5, kind: input, shape index: {}]   ;;  %s5330_s6 = inlined_call_operand.<no memory space> [shape: f32[1,1], index: 6, kind: input, shape index: {}]   ;;  %s5331_s7 = inlined_call_operand.hbm [shape: f32[1,256], index: 7, kind: output, shape index: {}]  }
   0x1   :  { %12 = sst [smem:[#allocation2]] %s5330_s6 }
   0x2   :  { %13 = vsyncpa [#allocation5], 0 }
   0x3   :  { %15 = vsyncpa [#allocation5 + $0x1], 0  ;;  %s4028_s26 = smov 0   ;;  %s4030_s27 = smov 0  }
   0x4   :  { %s4032_s28 = smov 0   ;;  %s4034_s29 = smov 0  }
   0x5 LB: > { %s3058_s6 = sadd.s32 4294967295, %s3979_s29   ;;  %s3059_s30 = sadd.s32 4294967294, %s3979_s29   ;;  %s3979_s29 = sphi %s4034_s29, %s5351_s29   ;;  %s3975_s28 = sphi %s4032_s28, %s5350_s28   ;;  %s3971_s27 = sphi %s4030_s27, %s5349_s27   ;;  %s3967_s26 = sphi %s4028_s26, %s5348_s26  }
   0x6   : > { %s4051_s8 = sadd.s32 1, %s3979_s29   ;;  %s28_s9 = sadd.s32 1, %s3975_s28 }
   0x7   : > { %s25_s10 = ssub.s32 %s3979_s29, %s4051_s8  ;;  %p35_p0 = scmp.ne.s32.totalorder %s3975_s28, %s3971_s27 }
   0x8   : > { %p26_p1 = scmp.eq.s32.totalorder %s25_s10, 0  ;;  %p36_p2 = scmp.eq.s32.totalorder %s3979_s29, 0 }
   0x9   : > { %p191_p3 = scmp.eq.s32.totalorder %s3058_s6, 1  ;;  %p196_p4 = scmp.ne.s32.totalorder %s3971_s27, %s3967_s26 }
   0xa   : > { %s4064_s11 = scalar_select %p26_p1, %s3975_s28, %s28_s9  }
   0xb   : > { %p37_p5 = por %p36_p2, %p35_p0  ;;  %p4066_p6 = por %p191_p3, %p35_p0 }
   0xc   : > { %p197_p7 = scmp.eq.s32.totalorder %s3059_s30, 1  ;;  %p3061_p9 = scmp.ge.s32.totalorder %s3979_s29, 2 }
   0xe   : > { %p4070_p8 = por %p197_p7, %p196_p4  ;;  %231 = sbr.rel (%p3061_p9) target bundleno = 28 (0x1c), region = 40 }
  0x15   : > { %234 = sbr.rel (!%p37_p5) target bundleno = 28 (0x1c), region = 44  ;;  %s236_s14 = sand.u32 (%p37_p5), 1, %s3975_s28  }
  0x16   : > { %s3063_s15 = sshll.u32 (%p37_p5), %s3979_s29, 2  ;;  %s3062_s16 = sshll.u32 (%p37_p5), %s236_s14, 3 }
  0x17   : > { %s240_s19 = scalar_lea.vmem (%p37_p5), %s5324_s0, %s3063_s15  ;;  %s238_s20 = scalar_lea.vmem (%p37_p5), [#allocation3], %s3062_s16 }
  0x18   : > { %v256_v0 = vld [vmem:[%s240_s19] sm:$0xf] (%p37_p5)  ;;  %v258_v1 = vld [vmem:[%s240_s19 + $0x8] sm:$0xf] (%p37_p5) }
  0x19   : > { %257 = vst [vmem:[%s238_s20] sm:$0xf] (%p37_p5), %v256_v0  ;;  %259 = vst [vmem:[%s238_s20 + $0x4] sm:$0xf] (%p37_p5), %v258_v1 }
  0x1c PF: > { %p3064_p10 = scmp.ge.s32.totalorder %s3979_s29, 1  ;;  %p285_p11 = scmp.lt.s32.totalorder %s3979_s29, 3 }
  0x1e   : > { %p286_p12 = pnand %p3064_p10, %p285_p11 }
  0x20   : > { %289 = sbr.rel (%p286_p12) target bundleno = 883 (0x373), region = 85 }
  0x27   : > { %v377_v2 = vld [vmem:[%s5326_s2 + $0x10] sm:$0xff]  ;;  %v375_v3 = vld [vmem:[%s5326_s2] sm:$0xff]  ;;  %s4091_s25 = sand.u32 1, %s3971_s27   ;;  %v3981_v4 = vmov 0   ;;  %v378_v5 = vld [vmem:[%s5326_s2 + $0x18] sm:$0xff]  ;;  %v3982_v7 = vmov 0.0  }
  0x28   : > { %3600 = vset.pattern.permute.xlu1 %v3981_v4  ;;  %3599 = vset.pattern.permute.xlu0 %v3981_v4  ;;  %s3065_s30 = sshll.u32 %s4091_s25, 3  ;;  %v376_v6 = vld [vmem:[%s5326_s2 + $0x8] sm:$0xff]  ;;  %vm3983_vm0 = vmmov 0   ;;  %v3602_v9 = vld [vmem:[%s5325_s1] sm:$0xff]   ;;  %vm806_vm1 = vcmask 130048   ;;  %v382_v12 = vld [vmem:[%s5326_s2 + $0x38] sm:$0xff] }
  0x29   : > { %437 = vperm.xlu1 %3600, %v377_v2   ;;  %427 = vperm.xlu0 %3599, %v375_v3   ;;  %s294_s16 = scalar_lea.vmem [#allocation3], %s3065_s30  ;;  %v380_v10 = vld [vmem:[%s5326_s2 + $0x28] sm:$0xff]  ;;  %v379_v11 = vld [vmem:[%s5326_s2 + $0x20] sm:$0xff]  ;;  %v381_v13 = vld [vmem:[%s5326_s2 + $0x30] sm:$0xff]  ;;  %s2981_s15 = sld [smem:[#allocation2]] }
  0x2a   : > { %3329 = vmatprep.subr.bf16.mxu0 %v3982_v7  ;;  %v3601_v8 = vld [vmem:[%s294_s16] sm:$0xff]   ;;  %3331 = vmatprep.mubr.msk.bf16.mxu0 %vm3983_vm0, %v3982_v7  ;;  %v386_v17 = vld [vmem:[%s5326_s2 + $0x58] sm:$0xff]  ;;  %v385_v18 = vld [vmem:[%s5326_s2 + $0x50] sm:$0xff]  ;;  %s3300_s16 = sshll.u32 %s3058_s6, 4  ;;  %s321_s17 = scalar_lea.vmem [#allocation4], %s4091_s25 }
  0x2b   : > { %3431 = vmatprep.subr.bf16.mxu1 %v3981_v4  ;;  %3330 = vmatpush3.bf16.msra.mxu0 %v3601_v8  ;;  %v3603_v14 = vld [vmem:[%s5325_s1 + $0x8] sm:$0xff]   ;;  %v383_v16 = vld [vmem:[%s5326_s2 + $0x40] sm:$0xff]  ;;  %v3604_v19 = vld [vmem:[%s5325_s1 + $0x10] sm:$0xff]   ;;  %s2998_s18 = sshll.u32 %s321_s17, 4  ;;  %s5280_s21 = scalar_lea.hbm %s5331_s7, %s3300_s16  ;;  %s5282_s18 = int_to_ptr.vmem [resolvable:$true] %s2998_s18 }
  0x2c   : > { %2112 = vmatprep.subr.bf16.mxu0 %v3981_v4  ;;  %v384_v15 = vld [vmem:[%s5326_s2 + $0x48] sm:$0xff]  ;;  %v387_v21 = vld [vmem:[%s5326_s2 + $0x60] sm:$0xff]  ;;  %v390_v22 = vld [vmem:[%s5326_s2 + $0x78] sm:$0xff]  ;;  %s2986_s22 = scalar_lea.sflag [#allocation5], %s4091_s25  ;;  %s3917_s23 = scalar_lea.vmem %s5282_s18, 16 }
  0x2d   : > { %442 = vperm.xlu1 %3600, %v378_v5   ;;  %432 = vperm.xlu0 %3599, %v376_v6   ;;  %v388_v20 = vld [vmem:[%s5326_s2 + $0x68] sm:$0xff]  ;;  %v389_v23 = vld [vmem:[%s5326_s2 + $0x70] sm:$0xff]  ;;  %v3605_v24 = vld [vmem:[%s5325_s1 + $0x18] sm:$0xff]   ;;  %p3918_p13 = scmp.ne.s32.totalorder %s5282_s18, %s3917_s23  ;;  %s3984_s6 = smov [#allocation4]  }
  0x2e   : > { %3332 = vmatmul.mubr.msk.bf16.vlgmr.msra.gmra.mrb[0].mxu0 %vm806_vm1, %v3602_v9  ;;  %v392_v25 = vld [vmem:[%s5326_s2 + $0x88] sm:$0xff]  ;;  %v391_v26 = vld [vmem:[%s5326_s2 + $0x80] sm:$0xff]  ;;  %v394_v27 = vld [vmem:[%s5326_s2 + $0x98] sm:$0xff]  ;;  %s3921_s24 = sshll.u32 %s3984_s6, 4  ;;  %s3922_s24 = int_to_ptr.vmem [resolvable:$false] %s3921_s24 }
  0x2f   : > { %3335 = vmatprep.mubr.msk.bf16.mxu0 %vm3983_vm0, %v3982_v7  ;;  %v393_v28 = vld [vmem:[%s5326_s2 + $0x90] sm:$0xff]  ;;  %v3606_v29 = vld [vmem:[%s5325_s1 + $0x20] sm:$0xff]   ;;  %v396_v30 = vld [vmem:[%s5326_s2 + $0xa8] sm:$0xff]  ;;  %p3919_p0 = pnand %p3918_p13, %p4066_p6  ;;  %s3923_s30 = scalar_lea.vmem %s3922_s24, 32 }
  0x30   : > { %v395_v31 = vld [vmem:[%s5326_s2 + $0xa0] sm:$0xff]  ;;  %v398_v32 = vld [vmem:[%s5326_s2 + $0xb8] sm:$0xff]  ;;  %v397_v33 = vld [vmem:[%s5326_s2 + $0xb0] sm:$0xff]  ;;  %p3924_p2 = scmp.lt.s32.totalorder %s5282_s18, %s3922_s24  ;;  %p3925_p3 = scmp.lt.s32.totalorder %s3923_s30, %s3917_s23 }
  0x31   : > { %452 = vperm.xlu1 %3600, %v380_v10   ;;  %447 = vperm.xlu0 %3599, %v379_v11   ;;  %v3607_v34 = vld [vmem:[%s5325_s1 + $0x28] sm:$0xff]   ;;  %v399_v36 = vld [vmem:[%s5326_s2 + $0xc0] sm:$0xff]  ;;  %v402_v37 = vld [vmem:[%s5326_s2 + $0xd8] sm:$0xff]  ;;  %p3920_p1 = pneg %p3919_p0 }
  0x32   : > { %v400_v35 = vld [vmem:[%s5326_s2 + $0xc8] sm:$0xff]  ;;  %v401_v38 = vld [vmem:[%s5326_s2 + $0xd0] sm:$0xff]  ;;  %v403_v41 = vld [vmem:[%s5326_s2 + $0xe0] sm:$0xff]  ;;  %p3926_p4 = por %p3925_p3, %p3924_p2 }
  0x33   : > { %v3608_v39 = vld [vmem:[%s5325_s1 + $0x30] sm:$0xff]   ;;  %v404_v40 = vld [vmem:[%s5326_s2 + $0xe8] sm:$0xff]  ;;  %v406_v42 = vld [vmem:[%s5326_s2 + $0xf8] sm:$0xff] }
  0x34   : > { %v405_v43 = vld [vmem:[%s5326_s2 + $0xf0] sm:$0xff]  ;;  %v3609_v44 = vld [vmem:[%s5325_s1 + $0x38] sm:$0xff]   ;;  %v408_v45 = vld [vmem:[%s5326_s2 + $0x108] sm:$0xff]  ;;  %p3927_p5 = pnand %p3926_p4, %p3920_p1 }
  0x35   : > { %462 = vperm.xlu1 %3600, %v382_v12   ;;  %457 = vperm.xlu0 %3599, %v381_v13   ;;  %v407_v46 = vld [vmem:[%s5326_s2 + $0x100] sm:$0xff]  ;;  %v410_v47 = vld [vmem:[%s5326_s2 + $0x118] sm:$0xff]  ;;  %v409_v48 = vld [vmem:[%s5326_s2 + $0x110] sm:$0xff] }
  0x36   : > { %3336 = vmatmul.mubr.msk.bf16.gmra.mrb[4].mxu0 %vm806_vm1, %v3603_v14  ;;  %v3610_v49 = vld [vmem:[%s5325_s1 + $0x40] sm:$0xff]   ;;  %v412_v50 = vld [vmem:[%s5326_s2 + $0x128] sm:$0xff]  ;;  %v414_v52 = vld [vmem:[%s5326_s2 + $0x138] sm:$0xff] }
  0x37   : > { %3339 = vmatprep.mubr.msk.bf16.mxu0 %vm3983_vm0, %v3982_v7  ;;  %v411_v51 = vld [vmem:[%s5326_s2 + $0x120] sm:$0xff]  ;;  %v413_v53 = vld [vmem:[%s5326_s2 + $0x130] sm:$0xff]  ;;  %v3611_v54 = vld [vmem:[%s5325_s1 + $0x48] sm:$0xff]  }
  0x38   : > { %v416_v55 = vld [vmem:[%s5326_s2 + $0x148] sm:$0xff]  ;;  %v415_v56 = vld [vmem:[%s5326_s2 + $0x140] sm:$0xff]  ;;  %v418_v57 = vld [vmem:[%s5326_s2 + $0x158] sm:$0xff] }
  0x39   : > { %472 = vperm.xlu1 %3600, %v384_v15   ;;  %467 = vperm.xlu0 %3599, %v383_v16   ;;  %v417_v58 = vld [vmem:[%s5326_s2 + $0x150] sm:$0xff]  ;;  %v420_v60 = vld [vmem:[%s5326_s2 + $0x168] sm:$0xff]  ;;  %v419_v61 = vld [vmem:[%s5326_s2 + $0x160] sm:$0xff] }
  0x3a   : > { %v3612_v59 = vld [vmem:[%s5325_s1 + $0x50] sm:$0xff]   ;;  %v422_v62 = vld [vmem:[%s5326_s2 + $0x178] sm:$0xff]  ;;  %v424_v1 = vld [vmem:[%s5326_s2 + $0x188] sm:$0xff] }
  0x3b   : > { %v421_v63 = vld [vmem:[%s5326_s2 + $0x170] sm:$0xff]  ;;  %v3613_v0 = vld [vmem:[%s5325_s1 + $0x58] sm:$0xff]   ;;  %v423_v2 = vld [vmem:[%s5326_s2 + $0x180] sm:$0xff] }
  0x3c   : > { %v1467_v3 = vld [vmem:[%s5328_s4 + $0x8] sm:$0xff]  ;;  %v1466_v5 = vld [vmem:[%s5328_s4] sm:$0xff]  ;;  %v1469_v8 = vld [vmem:[%s5328_s4 + $0x18] sm:$0xff] }
  0x3d   : > { %482 = vperm.xlu1 %3600, %v386_v17   ;;  %477 = vperm.xlu0 %3599, %v385_v18   ;;  %v3614_v6 = vld [vmem:[%s5325_s1 + $0x60] sm:$0xff]   ;;  %v1468_v9 = vld [vmem:[%s5328_s4 + $0x10] sm:$0xff]  ;;  %v1471_v10 = vld [vmem:[%s5328_s4 + $0x28] sm:$0xff] }
  0x3e   : > { %3340 = vmatmul.mubr.msk.bf16.gmra.mrb[8].mxu0 %vm806_vm1, %v3604_v19  ;;  %v1470_v11 = vld [vmem:[%s5328_s4 + $0x20] sm:$0xff]  ;;  %v3615_v12 = vld [vmem:[%s5325_s1 + $0x68] sm:$0xff]   ;;  %v1473_v13 = vld [vmem:[%s5328_s4 + $0x38] sm:$0xff] }
  0x3f   : > { %3343 = vmatprep.mubr.msk.bf16.mxu0 %vm3983_vm0, %v3982_v7  ;;  %v1472_v14 = vld [vmem:[%s5328_s4 + $0x30] sm:$0xff]  ;;  %v1475_v15 = vld [vmem:[%s5328_s4 + $0x48] sm:$0xff]  ;;  %v1474_v16 = vld [vmem:[%s5328_s4 + $0x40] sm:$0xff] }
  0x40   : > { %v3616_v17 = vld [vmem:[%s5325_s1 + $0x70] sm:$0xff]   ;;  %v1477_v18 = vld [vmem:[%s5328_s4 + $0x58] sm:$0xff] }
  0x41   : > { %492 = vperm.xlu1 %3600, %v388_v20   ;;  %487 = vperm.xlu0 %3599, %v387_v21   ;;  %v1476_v19 = vld [vmem:[%s5328_s4 + $0x50] sm:$0xff]  ;;  %v1479_v20 = vld [vmem:[%s5328_s4 + $0x68] sm:$0xff]  ;;  %v1478_v21 = vld [vmem:[%s5328_s4 + $0x60] sm:$0xff] }
  0x45   : > { %502 = vperm.xlu1 %3600, %v390_v22   ;;  %497 = vperm.xlu0 %3599, %v389_v23   ;;  %v3617_v22 = vld [vmem:[%s5325_s1 + $0x78] sm:$0xff]  }
  0x46   : > { %3344 = vmatmul.mubr.msk.bf16.gmra.mrb[12].mxu0 %vm806_vm1, %v3605_v24  ;;  %v1481_v23 = vld [vmem:[%s5328_s4 + $0x78] sm:$0xff]  ;;  %v1480_v24 = vld [vmem:[%s5328_s4 + $0x70] sm:$0xff] }
  0x47   : > { %3347 = vmatprep.mubr.msk.bf16.mxu0 %vm3983_vm0, %v3982_v7 }
  0x49   : > { %512 = vperm.xlu1 %3600, %v392_v25   ;;  %507 = vperm.xlu0 %3599, %v391_v26   ;;  %v1483_v25 = vld [vmem:[%s5328_s4 + $0x88] sm:$0xff]  ;;  %v1482_v26 = vld [vmem:[%s5328_s4 + $0x80] sm:$0xff] }
  0x4d   : > { %522 = vperm.xlu1 %3600, %v394_v27   ;;  %517 = vperm.xlu0 %3599, %v393_v28   ;;  %v3618_v27 = vld [vmem:[%s5325_s1 + $0x80] sm:$0xff]   ;;  %v1485_v28 = vld [vmem:[%s5328_s4 + $0x98] sm:$0xff] }
  0x4e   : > { %3348 = vmatmul.mubr.msk.bf16.gmra.mrb[16].mxu0 %vm806_vm1, %v3606_v29  ;;  %v1484_v29 = vld [vmem:[%s5328_s4 + $0x90] sm:$0xff] }
  0x4f   : > { %3351 = vmatprep.mubr.msk.bf16.mxu0 %vm3983_vm0, %v3982_v7 }
  0x51   : > { %532 = vperm.xlu1 %3600, %v396_v30   ;;  %527 = vperm.xlu0 %3599, %v395_v31   ;;  %v1487_v30 = vld [vmem:[%s5328_s4 + $0xa8] sm:$0xff]  ;;  %v1486_v31 = vld [vmem:[%s5328_s4 + $0xa0] sm:$0xff] }
  0x55   : > { %542 = vperm.xlu1 %3600, %v398_v32   ;;  %537 = vperm.xlu0 %3599, %v397_v33   ;;  %v3619_v32 = vld [vmem:[%s5325_s1 + $0x88] sm:$0xff]   ;;  %v1489_v33 = vld [vmem:[%s5328_s4 + $0xb8] sm:$0xff] }
  0x56   : > { %3352 = vmatmul.mubr.msk.bf16.gmra.mrb[20].mxu0 %vm806_vm1, %v3607_v34  ;;  %v1488_v34 = vld [vmem:[%s5328_s4 + $0xb0] sm:$0xff] }
  0x57   : > { %3355 = vmatprep.mubr.msk.bf16.mxu0 %vm3983_vm0, %v3982_v7 }
  0x59   : > { %552 = vperm.xlu1 %3600, %v400_v35   ;;  %547 = vperm.xlu0 %3599, %v399_v36   ;;  %v1491_v35 = vld [vmem:[%s5328_s4 + $0xc8] sm:$0xff]  ;;  %v1490_v36 = vld [vmem:[%s5328_s4 + $0xc0] sm:$0xff] }
  0x5d   : > { %562 = vperm.xlu1 %3600, %v402_v37   ;;  %557 = vperm.xlu0 %3599, %v401_v38   ;;  %v3620_v37 = vld [vmem:[%s5325_s1 + $0x90] sm:$0xff]   ;;  %v1493_v38 = vld [vmem:[%s5328_s4 + $0xd8] sm:$0xff] }
  0x5e   : > { %3356 = vmatmul.mubr.msk.bf16.gmra.mrb[24].mxu0 %vm806_vm1, %v3608_v39  ;;  %v1492_v39 = vld [vmem:[%s5328_s4 + $0xd0] sm:$0xff] }
  0x5f   : > { %3359 = vmatprep.mubr.msk.bf16.mxu0 %vm3983_vm0, %v3982_v7 }
  0x61   : > { %572 = vperm.xlu1 %3600, %v404_v40   ;;  %567 = vperm.xlu0 %3599, %v403_v41   ;;  %v1495_v40 = vld [vmem:[%s5328_s4 + $0xe8] sm:$0xff]  ;;  %v1494_v41 = vld [vmem:[%s5328_s4 + $0xe0] sm:$0xff] }
  0x65   : > { %582 = vperm.xlu1 %3600, %v406_v42   ;;  %577 = vperm.xlu0 %3599, %v405_v43   ;;  %v3621_v42 = vld [vmem:[%s5325_s1 + $0x98] sm:$0xff]  }
  0x66   : > { %3360 = vmatmul.mubr.msk.bf16.gmra.mrb[28].mxu0 %vm806_vm1, %v3609_v44  ;;  %v1497_v43 = vld [vmem:[%s5328_s4 + $0xf8] sm:$0xff]  ;;  %v1496_v44 = vld [vmem:[%s5328_s4 + $0xf0] sm:$0xff] }
  0x67   : > { %3363 = vmatprep.mubr.msk.bf16.mxu0 %vm3983_vm0, %v3982_v7 }
  0x69   : > { %592 = vperm.xlu1 %3600, %v408_v45   ;;  %587 = vperm.xlu0 %3599, %v407_v46   ;;  %v1499_v45 = vld [vmem:[%s5328_s4 + $0x108] sm:$0xff]  ;;  %v1498_v46 = vld [vmem:[%s5328_s4 + $0x100] sm:$0xff] }
  0x6d   : > { %602 = vperm.xlu1 %3600, %v410_v47   ;;  %597 = vperm.xlu0 %3599, %v409_v48   ;;  %v3622_v47 = vld [vmem:[%s5325_s1 + $0xa0] sm:$0xff]   ;;  %v1501_v48 = vld [vmem:[%s5328_s4 + $0x118] sm:$0xff] }
  0x6e   : > { %3364 = vmatmul.mubr.msk.bf16.gmra.mrb[32].mxu0 %vm806_vm1, %v3610_v49  ;;  %v1500_v49 = vld [vmem:[%s5328_s4 + $0x110] sm:$0xff] }
  0x6f   : > { %3367 = vmatprep.mubr.msk.bf16.mxu0 %vm3983_vm0, %v3982_v7 }
  0x71   : > { %612 = vperm.xlu1 %3600, %v412_v50   ;;  %607 = vperm.xlu0 %3599, %v411_v51   ;;  %v2672_v51 = vld [vmem:[%s5329_s5] sm:$0xff] }
  0x75   : > { %622 = vperm.xlu1 %3600, %v414_v52   ;;  %617 = vperm.xlu0 %3599, %v413_v53   ;;  %v1502_v52 = vld [vmem:[%s5328_s4 + $0x120] sm:$0xff] }
  0x76   : > { %3368 = vmatmul.mubr.msk.bf16.gmra.mrb[36].mxu0 %vm806_vm1, %v3611_v54  ;;  %v3623_v54 = vld [vmem:[%s5325_s1 + $0xa8] sm:$0xff]  }
  0x77   : > { %3371 = vmatprep.mubr.msk.bf16.mxu0 %vm3983_vm0, %v3982_v7 }
  0x79   : > { %632 = vperm.xlu1 %3600, %v416_v55   ;;  %627 = vperm.xlu0 %3599, %v415_v56   ;;  %v2674_v55 = vld [vmem:[%s5329_s5 + $0x10] sm:$0xff]  ;;  %v2673_v56 = vld [vmem:[%s5329_s5 + $0x8] sm:$0xff] }
  0x7d   : > { %642 = vperm.xlu1 %3600, %v418_v57   ;;  %637 = vperm.xlu0 %3599, %v417_v58  }
  0x7e   : > { %3372 = vmatmul.mubr.msk.bf16.gmra.mrb[40].mxu0 %vm806_vm1, %v3612_v59  ;;  %v2676_v59 = vld [vmem:[%s5329_s5 + $0x20] sm:$0xff] }
  0x7f   : > { %3375 = vmatprep.mubr.msk.bf16.mxu0 %vm3983_vm0, %v3982_v7 }
  0x81   : > { %652 = vperm.xlu1 %3600, %v420_v60   ;;  %647 = vperm.xlu0 %3599, %v419_v61   ;;  %v2675_v60 = vld [vmem:[%s5329_s5 + $0x18] sm:$0xff]  ;;  %v3624_v61 = vld [vmem:[%s5325_s1 + $0xb0] sm:$0xff]  }
  0x85   : > { %662 = vperm.xlu1 %3600, %v422_v62   ;;  %657 = vperm.xlu0 %3599, %v421_v63   ;;  %v2678_v63 = vld [vmem:[%s5329_s5 + $0x30] sm:$0xff] }
  0x86   : > { %3376 = vmatmul.mubr.msk.bf16.gmra.mrb[44].mxu0 %vm806_vm1, %v3613_v0  ;;  %v2677_v0 = vld [vmem:[%s5329_s5 + $0x28] sm:$0xff] }
  0x87   : > { %3379 = vmatprep.mubr.msk.bf16.mxu0 %vm3983_vm0, %v3982_v7 }
  0x89   : > { %672 = vperm.xlu1 %3600, %v424_v1   ;;  %667 = vperm.xlu0 %3599, %v423_v2   ;;  %v2680_v2 = vld [vmem:[%s5329_s5 + $0x40] sm:$0xff] }
  0x8d   : > { %1511 = vperm.xlu1 %3600, %v1467_v3   ;;  %1506 = vperm.xlu0 %3599, %v1466_v5   ;;  %v2679_v3 = vld [vmem:[%s5329_s5 + $0x38] sm:$0xff] }
  0x8e   : > { %3380 = vmatmul.mubr.msk.bf16.gmra.mrb[48].mxu0 %vm806_vm1, %v3614_v6  ;;  %v3625_v5 = vld [vmem:[%s5325_s1 + $0xb8] sm:$0xff]  }
  0x8f   : > { %3383 = vmatprep.mubr.msk.bf16.mxu0 %vm3983_vm0, %v3982_v7 }
  0x91   : > { %1521 = vperm.xlu1 %3600, %v1469_v8   ;;  %1516 = vperm.xlu0 %3599, %v1468_v9   ;;  %v2682_v9 = vld [vmem:[%s5329_s5 + $0x50] sm:$0xff] }
  0x95   : > { %1531 = vperm.xlu1 %3600, %v1471_v10   ;;  %1526 = vperm.xlu0 %3599, %v1470_v11   ;;  %v2681_v10 = vld [vmem:[%s5329_s5 + $0x48] sm:$0xff] }
  0x96   : > { %3384 = vmatmul.mubr.msk.bf16.gmra.mrb[52].mxu0 %vm806_vm1, %v3615_v12  ;;  %v2684_v12 = vld [vmem:[%s5329_s5 + $0x60] sm:$0xff] }
  0x97   : > { %3387 = vmatprep.mubr.msk.bf16.mxu0 %vm3983_vm0, %v3982_v7 }
  0x99   : > { %1541 = vperm.xlu1 %3600, %v1473_v13   ;;  %1536 = vperm.xlu0 %3599, %v1472_v14   ;;  %v2683_v13 = vld [vmem:[%s5329_s5 + $0x58] sm:$0xff] }
  0x9d   : > { %1551 = vperm.xlu1 %3600, %v1475_v15   ;;  %1546 = vperm.xlu0 %3599, %v1474_v16   ;;  %v3626_v15 = vld [vmem:[%s5325_s1 + $0xc0] sm:$0xff]   ;;  %v2685_v16 = vld [vmem:[%s5329_s5 + $0x68] sm:$0xff] }
  0x9e   : > { %3388 = vmatmul.mubr.msk.bf16.gmra.mrb[56].mxu0 %vm806_vm1, %v3616_v17 }
  0x9f   : > { %3391 = vmatprep.mubr.msk.bf16.mxu0 %vm3983_vm0, %v3982_v7 }
  0xa1   : > { %1561 = vperm.xlu1 %3600, %v1477_v18   ;;  %1556 = vperm.xlu0 %3599, %v1476_v19   ;;  %v2688_v19 = vld [vmem:[%s5329_s5 + $0x80] sm:$0xff] }
  0xa5   : > { %1571 = vperm.xlu1 %3600, %v1479_v20   ;;  %1566 = vperm.xlu0 %3599, %v1478_v21   ;;  %v2687_v20 = vld [vmem:[%s5329_s5 + $0x78] sm:$0xff] }
  0xa6   : > { %3392 = vmatmul.mubr.msk.bf16.gmra.mrb[60].mxu0 %vm806_vm1, %v3617_v22  ;;  %v2690_v22 = vld [vmem:[%s5329_s5 + $0x90] sm:$0xff] }
  0xa7   : > { %3395 = vmatprep.mubr.msk.bf16.mxu0 %vm3983_vm0, %v3982_v7 }
  0xa8   : > { %v4479_v50 = vpop.permute.xlu1 %437  ;;  %v4487_v53 = vpop.permute.xlu0 %427 }
  0xa9   : > { %1581 = vperm.xlu1 %3600, %v1481_v23   ;;  %1576 = vperm.xlu0 %3599, %v1480_v24   ;;  %v2689_v23 = vld [vmem:[%s5329_s5 + $0x88] sm:$0xff] }
  0xac   : > { %v4499_v57 = vpop.permute.xlu1 %442  ;;  %v4503_v58 = vpop.permute.xlu0 %432 }
  0xad   : > { %1591 = vperm.xlu1 %3600, %v1483_v25   ;;  %1586 = vperm.xlu0 %3599, %v1482_v26   ;;  %v2692_v25 = vld [vmem:[%s5329_s5 + $0xa0] sm:$0xff]  ;;  %v2691_v26 = vld [vmem:[%s5329_s5 + $0x98] sm:$0xff] }
  0xae   : > { %3396 = vmatmul.mubr.msk.bf16.gmra.mrb[64].mxu0 %vm806_vm1, %v3618_v27 }
  0xaf   : > { %3399 = vmatprep.mubr.msk.bf16.mxu0 %vm3983_vm0, %v3982_v7 }
  0xb0   : > { %v4514_v62 = vpop.permute.xlu1 %452  ;;  %v4522_v1 = vpop.permute.xlu0 %447 }
  0xb1   : > { %1601 = vperm.xlu1 %3600, %v1485_v28   ;;  %1596 = vperm.xlu0 %3599, %v1484_v29   ;;  %v2694_v29 = vld [vmem:[%s5329_s5 + $0xb0] sm:$0xff] }
  0xb4   : > { %v4536_v6 = vpop.permute.xlu1 %462  ;;  %v4538_v8 = vpop.permute.xlu0 %457 }
  0xb5   : > { %1611 = vperm.xlu1 %3600, %v1487_v30   ;;  %1606 = vperm.xlu0 %3599, %v1486_v31   ;;  %v2693_v30 = vld [vmem:[%s5329_s5 + $0xa8] sm:$0xff] }
  0xb6   : > { %3400 = vmatmul.mubr.msk.bf16.gmra.mrb[68].mxu0 %vm806_vm1, %v3619_v32 }
  0xb7   : > { %3403 = vmatprep.mubr.msk.bf16.mxu0 %vm3983_vm0, %v3982_v7 }
  0xb8   : > { %v4549_v11 = vpop.permute.xlu1 %472  ;;  %v4557_v14 = vpop.permute.xlu0 %467 }
  0xb9   : > { %1621 = vperm.xlu1 %3600, %v1489_v33   ;;  %1616 = vperm.xlu0 %3599, %v1488_v34   ;;  %v2696_v33 = vld [vmem:[%s5329_s5 + $0xc0] sm:$0xff]  ;;  %v2695_v34 = vld [vmem:[%s5329_s5 + $0xb8] sm:$0xff] }
  0xbc   : > { %v4569_v17 = vpop.permute.xlu1 %482  ;;  %v4571_v18 = vpop.permute.xlu0 %477 }
  0xbd   : > { %1631 = vperm.xlu1 %3600, %v1491_v35   ;;  %1626 = vperm.xlu0 %3599, %v1490_v36  }
  0xbe   : > { %3404 = vmatmul.mubr.msk.bf16.gmra.mrb[72].mxu0 %vm806_vm1, %v3620_v37 }
  0xbf   : > { %3407 = vmatprep.mubr.msk.bf16.mxu0 %vm3983_vm0, %v3982_v7 }
  0xc0   : > { %v4579_v21 = vpop.permute.xlu1 %492  ;;  %v4587_v24 = vpop.permute.xlu0 %487 }
  0xc1   : > { %1641 = vperm.xlu1 %3600, %v1493_v38   ;;  %1636 = vperm.xlu0 %3599, %v1492_v39  }
  0xc4   : > { %v4595_v27 = vpop.permute.xlu1 %502  ;;  %v4597_v28 = vpop.permute.xlu0 %497 }
  0xc5   : > { %1651 = vperm.xlu1 %3600, %v1495_v40   ;;  %1646 = vperm.xlu0 %3599, %v1494_v41  }
  0xc6   : > { %3408 = vmatmul.mubr.msk.bf16.gmra.mrb[76].mxu0 %vm806_vm1, %v3621_v42  ;;  %v2698_v42 = vld [vmem:[%s5329_s5 + $0xd0] sm:$0xff] }
  0xc7   : > { %3411 = vmatprep.mubr.msk.bf16.mxu0 %vm3983_vm0, %v3982_v7 }
  0xc8   : > { %v4605_v31 = vpop.permute.xlu1 %512  ;;  %v4613_v35 = vpop.permute.xlu0 %507 }
  0xc9   : > { %1661 = vperm.xlu1 %3600, %v1497_v43   ;;  %1656 = vperm.xlu0 %3599, %v1496_v44   ;;  %v2697_v43 = vld [vmem:[%s5329_s5 + $0xc8] sm:$0xff] }
  0xcc   : > { %v4626_v44 = vpop.permute.xlu1 %522 }
  0xcd   : > { %1671 = vperm.xlu1 %3600, %v1499_v45   ;;  %1666 = vperm.xlu0 %3599, %v1498_v46   ;;  %v4628_v46 = vpop.permute.xlu0 %517 }
  0xce   : > { %3412 = vmatmul.mubr.msk.bf16.gmra.mrb[80].mxu0 %vm806_vm1, %v3622_v47 }
  0xcf   : > { %3415 = vmatprep.mubr.msk.bf16.mxu0 %vm3983_vm0, %v3982_v7 }
  0xd1   : > { %1681 = vperm.xlu1 %3600, %v1501_v48   ;;  %1676 = vperm.xlu0 %3599, %v1500_v49   ;;  %v1503_v48 = vld [vmem:[%s5328_s4 + $0x128] sm:$0xff]  ;;  %v2699_v49 = vld [vmem:[%s5329_s5 + $0xd8] sm:$0xff] }
  0xd5   : > { %2712 = vperm.xlu1 %3600, %v2672_v51   ;;  %1686 = vperm.xlu0 %3599, %v1502_v52  }
  0xd6   : > { %3416 = vmatmul.mubr.msk.bf16.gmra.mrb[84].mxu0 %vm806_vm1, %v3623_v54 }
  0xd7   : > { %3419 = vmatprep.mubr.msk.bf16.mxu0 %vm3983_vm0, %v3982_v7 }
  0xd9   : > { %2722 = vperm.xlu1 %3600, %v2674_v55   ;;  %2717 = vperm.xlu0 %3599, %v2673_v56   ;;  %v4640_v55 = vpop.permute.xlu1 %532 }
  0xdd   : > { %2732 = vperm.xlu1 %3600, %v2676_v59   ;;  %2727 = vperm.xlu0 %3599, %v2675_v60   ;;  %v2701_v59 = vld [vmem:[%s5329_s5 + $0xe8] sm:$0xff]  ;;  %v4651_v60 = vpop.permute.xlu0 %527 }
  0xde   : > { %3420 = vmatmul.mubr.msk.bf16.gmra.mrb[88].mxu0 %vm806_vm1, %v3624_v61 }
  0xdf   : > { %3423 = vmatprep.mubr.msk.bf16.mxu0 %vm3983_vm0, %v3982_v7 }
  0xe1   : > { %2742 = vperm.xlu1 %3600, %v2678_v63   ;;  %2737 = vperm.xlu0 %3599, %v2677_v0  }
  0xe5   : > { %2752 = vperm.xlu1 %3600, %v2680_v2   ;;  %2747 = vperm.xlu0 %3599, %v2679_v3   ;;  %v2702_v2 = vld [vmem:[%s5329_s5 + $0xf0] sm:$0xff] }
  0xe6   : > { %3424 = vmatmul.mubr.msk.bf16.gmra.mrb[92].mxu0 %vm806_vm1, %v3625_v5  ;;  %v3629_v3 = vld [vmem:[%s5327_s3 + $0x144] ss:$16 sps:$4 sm:$0xff]  }
  0xe7   : > { %3427 = vmatprep.mubr.msk.bf16.mxu0 %vm3983_vm0, %v3982_v7  ;;  %v2686_v7 = vld [vmem:[%s5329_s5 + $0x70] sm:$0xff]  ;;  %2224 = vmatprep.mubr.bf16.mxu1 %v3629_v3 }
  0xe8   : > { %v3632_v5 = vld [vmem:[%s5327_s3 + $0x4] ss:$16 sps:$4 sm:$0xff]  }
  0xe9   : > { %2762 = vperm.xlu1 %3600, %v2682_v9   ;;  %2757 = vperm.xlu0 %3599, %v2681_v10  }
  0xed   : > { %2772 = vperm.xlu1 %3600, %v2684_v12   ;;  %2767 = vperm.xlu0 %3599, %v2683_v13  }
  0xee   : > { %3428 = vmatmul.mubr.msk.bf16.gmra.mrb[96].mxu0 %vm806_vm1, %v3626_v15  ;;  %v4669_v15 = vpop.permute.xlu1 %542 }
  0xef   : > { %2144 = vmatprep.mubr.bf16.mxu0 %v3632_v5 }
  0xf1   : > { %2782 = vperm.xlu1 %3600, %v2686_v7   ;;  %2777 = vperm.xlu0 %3599, %v2685_v16   ;;  %v4671_v7 = vpop.permute.xlu0 %537 }
  0xf5   : > { %2792 = vperm.xlu1 %3600, %v2688_v19   ;;  %2787 = vperm.xlu0 %3599, %v2687_v20  }
  0xf9   : > { %2802 = vperm.xlu1 %3600, %v2690_v22   ;;  %2797 = vperm.xlu0 %3599, %v2689_v23   ;;  %v2705_v23 = vld [vmem:[%s5329_s5 + $0x108] sm:$0xff] }
  0xfd   : > { %2812 = vperm.xlu1 %3600, %v2692_v25   ;;  %2807 = vperm.xlu0 %3599, %v2691_v26   ;;  %v2704_v25 = vld [vmem:[%s5329_s5 + $0x100] sm:$0xff] }
 0x101   : > { %2822 = vperm.xlu1 %3600, %v2694_v29   ;;  %2817 = vperm.xlu0 %3599, %v2693_v30   ;;  %v916_v32 = vpop.f32.mrb[0].mxu0 }
 0x102   : > { %v4616_v36 = vadd.f32 %v916_v32, %v4487_v53  ;;  %v3333_v37 = vpop.f32.mrb[1].mxu0 }
 0x103   : > { %v919_v39 = vpop.f32.mrb[2].mxu0  ;;  %v2707_v37 = vld [vmem:[%s5329_s5 + $0x118] sm:$0xff] }
 0x104   : > { %v1165_v38 = vmul.f32 1.442695, %v4616_v36  ;;  %v920_v40 = vadd.f32 %v919_v39, %v4503_v58  ;;  %v3334_v41 = vpop.f32.mrb[3].mxu0  ;;  %vm1115_vm2 = vcmp.gt.f32.partialorder %v4616_v36, 0.0 }
 0x105   : > { %2832 = vperm.xlu1 %3600, %v2696_v33   ;;  %2827 = vperm.xlu0 %3599, %v2695_v34  }
 0x106   : > { %3741 = vpow2.f32 %v1165_v38  ;;  %v1167_v45 = vmul.f32 1.442695, %v920_v40  ;;  %vm1116_vm3 = vcmp.gt.f32.partialorder %v920_v40, 0.0  ;;  %v4694_v38 = vpop.permute.xlu0 %547 }
 0x108   : > { %3743 = vpow2.f32 %v1167_v45 }
 0x109   : > { %2842 = vperm.xlu1 %3600, %v2698_v42   ;;  %2837 = vperm.xlu0 %3599, %v2697_v43   ;;  %v924_v47 = vpop.f32.mrb[4].mxu0 }
 0x10a   : > { %v4637_v51 = vadd.f32 %v924_v47, %v4479_v50  ;;  %v3337_v52 = vpop.f32.mrb[5].mxu0  ;;  %v2700_v50 = vld [vmem:[%s5329_s5 + $0xe0] sm:$0xff] }
 0x10b   : > { %v927_v54 = vpop.f32.mrb[6].mxu0  ;;  %v2708_v52 = vld [vmem:[%s5329_s5 + $0x120] sm:$0xff] }
 0x10c   : > { %v1169_v53 = vmul.f32 1.442695, %v4637_v51  ;;  %v4643_v56 = vadd.f32 %v927_v54, %v4499_v57  ;;  %v3338_v58 = vpop.f32.mrb[7].mxu0  ;;  %v2703_v57 = vld [vmem:[%s5329_s5 + $0xf8] sm:$0xff]  ;;  %vm1117_vm4 = vcmp.gt.f32.partialorder %v4637_v51, 0.0 }
 0x10d   : > { %1691 = vperm.xlu1 %3600, %v1503_v48   ;;  %2847 = vperm.xlu0 %3599, %v2699_v49   ;;  %v2709_v49 = vld [vmem:[%s5329_s5 + $0x128] sm:$0xff] }
 0x10e   : > { %3745 = vpow2.f32 %v1169_v53  ;;  %v1171_v61 = vmul.f32 1.442695, %v4643_v56  ;;  %vm1118_vm5 = vcmp.gt.f32.partialorder %v4643_v56, 0.0 }
 0x110   : > { %v3742_v63 = vpop.eup %3741  ;;  %3747 = vpow2.f32 %v1171_v61 }
 0x111   : > { %2857 = vperm.xlu1 %3600, %v2701_v59   ;;  %2852 = vperm.xlu0 %3599, %v2700_v50   ;;  %v932_v0 = vpop.f32.mrb[8].mxu0  ;;  %v3117_v9 = vadd.f32 -1.0, %v3742_v63 }
 0x112   : > { %v4667_v10 = vadd.f32 %v932_v0, %v4522_v1  ;;  %v3341_v12 = vpop.f32.mrb[9].mxu0  ;;  %v3744_v13 = vpop.eup %3743 }
 0x113   : > { %v3118_v16 = vadd.f32 -1.0, %v3744_v13  ;;  %v935_v20 = vpop.f32.mrb[10].mxu0  ;;  %v1315_v26 = vsel %vm1115_vm2, %v4616_v36, %v3117_v9  ;;  %v2706_v36 = vld [vmem:[%s5329_s5 + $0x110] sm:$0xff] }
 0x114   : > { %v1173_v19 = vmul.f32 1.442695, %v4667_v10  ;;  %v4676_v1 = vadd.f32 %v935_v20, %v4514_v62  ;;  %v3342_v22 = vpop.f32.mrb[11].mxu0  ;;  %v4686_v62 = vpop.permute.xlu1 %552  ;;  %vm1119_vm6 = vcmp.gt.f32.partialorder %v4667_v10, 0.0 }
 0x115   : > { %2867 = vperm.xlu1 %3600, %v2703_v57   ;;  %2862 = vperm.xlu0 %3599, %v2702_v2   ;;  %v1316_v29 = vsel %vm1116_vm3, %v920_v40, %v3118_v16 }
 0x116   : > { %3749 = vpow2.f32 %v1173_v19  ;;  %v1365_v30 = vpack.c.bf16 %v1316_v29, %v1315_v26  ;;  %v1175_v32 = vmul.f32 1.442695, %v4676_v1  ;;  %vm1120_vm7 = vcmp.gt.f32.partialorder %v4676_v1, 0.0 }
 0x118   : > { %v3746_v33 = vpop.eup %3745  ;;  %3751 = vpow2.f32 %v1175_v32  ;;  %2113 = vmatpush1.bf16.msra.mxu0 %v1365_v30  ;;  %3447 = vmatpush1.bf16.msra.mxu1 %v1365_v30  ;;  %v4713_v61 = vpop.permute.xlu1 %562 }
 0x119   : > { %2877 = vperm.xlu1 %3600, %v2705_v23   ;;  %2872 = vperm.xlu0 %3599, %v2704_v25   ;;  %v940_v34 = vpop.f32.mrb[12].mxu0  ;;  %v3119_v39 = vadd.f32 -1.0, %v3746_v33 }
 0x11a   : > { %v4697_v40 = vadd.f32 %v940_v34, %v4538_v8  ;;  %v3345_v41 = vpop.f32.mrb[13].mxu0  ;;  %2114 = vmatprep.subr.bf16.mxu0 %v3981_v4  ;;  %3432 = vmatprep.subr.bf16.mxu1 %v3981_v4  ;;  %v3748_v42 = vpop.eup %3747 }
 0x11b   : > { %v3120_v43 = vadd.f32 -1.0, %v3748_v42  ;;  %v943_v47 = vpop.f32.mrb[14].mxu0  ;;  %v1317_v53 = vsel %vm1117_vm4, %v4637_v51, %v3119_v39 }
 0x11c   : > { %v1177_v45 = vmul.f32 1.442695, %v4697_v40  ;;  %v944_v48 = vadd.f32 %v943_v47, %v4536_v6  ;;  %v3346_v8 = vpop.f32.mrb[15].mxu0  ;;  %v4715_v6 = vpop.permute.xlu0 %557  ;;  %vm1121_vm8 = vcmp.gt.f32.partialorder %v4697_v40, 0.0 }
 0x11d   : > { %2887 = vperm.xlu1 %3600, %v2707_v37   ;;  %2882 = vperm.xlu0 %3599, %v2706_v36   ;;  %v1318_v54 = vsel %vm1118_vm5, %v4643_v56, %v3120_v43 }
 0x11e   : > { %3753 = vpow2.f32 %v1177_v45  ;;  %v1366_v58 = vpack.c.bf16 %v1318_v54, %v1317_v53  ;;  %v1179_v59 = vmul.f32 1.442695, %v944_v48  ;;  %vm1122_vm9 = vcmp.gt.f32.partialorder %v944_v48, 0.0 }
 0x120   : > { %v3750_v50 = vpop.eup %3749  ;;  %3755 = vpow2.f32 %v1179_v59  ;;  %2115 = vmatpush1.bf16.msra.mxu0 %v1366_v58  ;;  %3448 = vmatpush1.bf16.msra.mxu1 %v1366_v58 }
 0x121   : > { %2897 = vperm.xlu1 %3600, %v2709_v49   ;;  %2892 = vperm.xlu0 %3599, %v2708_v52   ;;  %v948_v63 = vpop.f32.mrb[16].mxu0  ;;  %v3121_v57 = vadd.f32 -1.0, %v3750_v50 }
 0x122   : > { %v949_v0 = vadd.f32 %v948_v63, %v4557_v14  ;;  %v3349_v51 = vpop.f32.mrb[17].mxu0  ;;  %2116 = vmatprep.subr.bf16.mxu0 %v3981_v4  ;;  %3433 = vmatprep.subr.bf16.mxu1 %v3981_v4  ;;  %v3752_v56 = vpop.eup %3751 }
 0x123   : > { %v3122_v2 = vadd.f32 -1.0, %v3752_v56  ;;  %v951_v5 = vpop.f32.mrb[18].mxu0  ;;  %v1319_v13 = vsel %vm1119_vm6, %v4667_v10, %v3121_v57 }
 0x124   : > { %v1181_v3 = vmul.f32 1.442695, %v949_v0  ;;  %v952_v9 = vadd.f32 %v951_v5, %v4549_v11  ;;  %v3350_v12 = vpop.f32.mrb[19].mxu0  ;;  %vm1123_vm10 = vcmp.gt.f32.partialorder %v949_v0, 0.0 }
 0x125   : > { %v1320_v14 = vsel %vm1120_vm7, %v4676_v1, %v3122_v2 }
 0x126   : > { %3757 = vpow2.f32 %v1181_v3  ;;  %v1367_v16 = vpack.c.bf16 %v1320_v14, %v1319_v13  ;;  %v1183_v19 = vmul.f32 1.442695, %v952_v9  ;;  %vm1124_vm11 = vcmp.gt.f32.partialorder %v952_v9, 0.0 }
 0x128   : > { %v3754_v20 = vpop.eup %3753  ;;  %3759 = vpow2.f32 %v1183_v19  ;;  %2117 = vmatpush1.bf16.msra.mxu0 %v1367_v16  ;;  %3449 = vmatpush1.bf16.msra.mxu1 %v1367_v16 }
 0x129   : > { %v956_v22 = vpop.f32.mrb[20].mxu0  ;;  %v3123_v23 = vadd.f32 -1.0, %v3754_v20  ;;  %2118 = vmatprep.subr.bf16.mxu0 %v3981_v4  ;;  %3434 = vmatprep.subr.bf16.mxu1 %v3981_v4 }
 0x12a   : > { %v957_v25 = vadd.f32 %v956_v22, %v4571_v18  ;;  %v3353_v26 = vpop.f32.mrb[21].mxu0  ;;  %v3756_v11 = vpop.eup %3755 }
 0x12b   : > { %v3124_v10 = vadd.f32 -1.0, %v3756_v11  ;;  %v959_v1 = vpop.f32.mrb[22].mxu0  ;;  %v1321_v33 = vsel %vm1121_vm8, %v4697_v40, %v3123_v23 }
 0x12c   : > { %v1185_v29 = vmul.f32 1.442695, %v957_v25  ;;  %v960_v30 = vadd.f32 %v959_v1, %v4569_v17  ;;  %v3354_v32 = vpop.f32.mrb[23].mxu0  ;;  %vm1125_vm12 = vcmp.gt.f32.partialorder %v957_v25, 0.0 }
 0x12d   : > { %v1322_v34 = vsel %vm1122_vm9, %v944_v48, %v3124_v10 }
 0x12e   : > { %3761 = vpow2.f32 %v1185_v29  ;;  %v1368_v18 = vpack.c.bf16 %v1322_v34, %v1321_v33  ;;  %v1187_v37 = vmul.f32 1.442695, %v960_v30  ;;  %vm1126_vm13 = vcmp.gt.f32.partialorder %v960_v30, 0.0 }
 0x130   : > { %v3758_v36 = vpop.eup %3757  ;;  %3763 = vpow2.f32 %v1187_v37  ;;  %2119 = vmatpush1.bf16.msra.mxu0 %v1368_v18  ;;  %3450 = vmatpush1.bf16.msra.mxu1 %v1368_v18 }
 0x131   : > { %v964_v39 = vpop.f32.mrb[24].mxu0  ;;  %v3125_v41 = vadd.f32 -1.0, %v3758_v36  ;;  %2120 = vmatprep.subr.bf16.mxu0 %v3981_v4  ;;  %3435 = vmatprep.subr.bf16.mxu1 %v3981_v4 }
 0x132   : > { %v965_v42 = vadd.f32 %v964_v39, %v4587_v24  ;;  %v3357_v43 = vpop.f32.mrb[25].mxu0  ;;  %v3760_v17 = vpop.eup %3759 }
 0x133   : > { %v3126_v45 = vadd.f32 -1.0, %v3760_v17  ;;  %v967_v47 = vpop.f32.mrb[26].mxu0  ;;  %v1323_v49 = vsel %vm1123_vm10, %v949_v0, %v3125_v41 }
 0x134   : > { %v1189_v40 = vmul.f32 1.442695, %v965_v42  ;;  %v968_v48 = vadd.f32 %v967_v47, %v4579_v21  ;;  %v3358_v8 = vpop.f32.mrb[27].mxu0  ;;  %vm1127_vm14 = vcmp.gt.f32.partialorder %v965_v42, 0.0 }
 0x135   : > { %v1324_v52 = vsel %vm1124_vm11, %v952_v9, %v3126_v45 }
 0x136   : > { %3765 = vpow2.f32 %v1189_v40  ;;  %v1369_v53 = vpack.c.bf16 %v1324_v52, %v1323_v49  ;;  %v1191_v54 = vmul.f32 1.442695, %v968_v48  ;;  %vm1128_vm15 = vcmp.gt.f32.partialorder %v968_v48, 0.0 }
 0x138   : > { %v3762_v24 = vpop.eup %3761  ;;  %3767 = vpow2.f32 %v1191_v54  ;;  %2121 = vmatpush1.bf16.msra.mxu0 %v1369_v53  ;;  %3451 = vmatpush1.bf16.msra.mxu1 %v1369_v53 }
 0x139   : > { %v972_v58 = vpop.f32.mrb[28].mxu0  ;;  %v3127_v59 = vadd.f32 -1.0, %v3762_v24  ;;  %2122 = vmatprep.subr.bf16.mxu0 %v3981_v4  ;;  %3436 = vmatprep.subr.bf16.mxu1 %v3981_v4 }
 0x13a   : > { %v973_v50 = vadd.f32 %v972_v58, %v4597_v28  ;;  %v3361_v63 = vpop.f32.mrb[29].mxu0  ;;  %v3764_v21 = vpop.eup %3763 }
 0x13b   : > { %v3128_v57 = vadd.f32 -1.0, %v3764_v21  ;;  %v975_v51 = vpop.f32.mrb[30].mxu0  ;;  %v1325_v3 = vsel %vm1125_vm12, %v957_v25, %v3127_v59 }
 0x13c   : > { %v1193_v0 = vmul.f32 1.442695, %v973_v50  ;;  %v976_v56 = vadd.f32 %v975_v51, %v4595_v27  ;;  %v3362_v2 = vpop.f32.mrb[31].mxu0  ;;  %vm1129_vm0 = vcmp.gt.f32.partialorder %v973_v50, 0.0 }
 0x13d   : > { %v1326_v5 = vsel %vm1126_vm13, %v960_v30, %v3128_v57 }
 0x13e   : > { %3769 = vpow2.f32 %v1193_v0  ;;  %v1370_v9 = vpack.c.bf16 %v1326_v5, %v1325_v3  ;;  %v1195_v12 = vmul.f32 1.442695, %v976_v56  ;;  %vm1130_vm2 = vcmp.gt.f32.partialorder %v976_v56, 0.0 }
 0x140   : > { %v3766_v28 = vpop.eup %3765  ;;  %3771 = vpow2.f32 %v1195_v12  ;;  %2123 = vmatpush1.bf16.msra.mxu0 %v1370_v9  ;;  %3452 = vmatpush1.bf16.msra.mxu1 %v1370_v9 }
 0x141   : > { %v980_v13 = vpop.f32.mrb[32].mxu0  ;;  %v3129_v14 = vadd.f32 -1.0, %v3766_v28  ;;  %2124 = vmatprep.subr.bf16.mxu0 %v3981_v4  ;;  %3437 = vmatprep.subr.bf16.mxu1 %v3981_v4 }
 0x142   : > { %v981_v16 = vadd.f32 %v980_v13, %v4613_v35  ;;  %v3365_v19 = vpop.f32.mrb[33].mxu0  ;;  %v3768_v27 = vpop.eup %3767 }
 0x143   : > { %v3130_v20 = vadd.f32 -1.0, %v3768_v27  ;;  %v983_v23 = vpop.f32.mrb[34].mxu0  ;;  %v1327_v11 = vsel %vm1127_vm14, %v965_v42, %v3129_v14 }
 0x144   : > { %v1197_v22 = vmul.f32 1.442695, %v981_v16  ;;  %v984_v25 = vadd.f32 %v983_v23, %v4605_v31  ;;  %v3366_v26 = vpop.f32.mrb[35].mxu0  ;;  %vm1131_vm3 = vcmp.gt.f32.partialorder %v981_v16, 0.0 }
 0x145   : > { %v1328_v10 = vsel %vm1128_vm15, %v968_v48, %v3130_v20 }
 0x146   : > { %3773 = vpow2.f32 %v1197_v22  ;;  %v1371_v29 = vpack.c.bf16 %v1328_v10, %v1327_v11  ;;  %v1199_v1 = vmul.f32 1.442695, %v984_v25  ;;  %vm1132_vm4 = vcmp.gt.f32.partialorder %v984_v25, 0.0 }
 0x148   : > { %v3770_v35 = vpop.eup %3769  ;;  %3775 = vpow2.f32 %v1199_v1  ;;  %2125 = vmatpush1.bf16.msra.mxu0 %v1371_v29  ;;  %3453 = vmatpush1.bf16.msra.mxu1 %v1371_v29 }
 0x149   : > { %v988_v30 = vpop.f32.mrb[36].mxu0  ;;  %v3131_v32 = vadd.f32 -1.0, %v3770_v35  ;;  %2126 = vmatprep.subr.bf16.mxu0 %v3981_v4  ;;  %3438 = vmatprep.subr.bf16.mxu1 %v3981_v4 }
 0x14a   : > { %v989_v33 = vadd.f32 %v988_v30, %v4628_v46  ;;  %v3369_v34 = vpop.f32.mrb[37].mxu0  ;;  %v3772_v31 = vpop.eup %3771 }
 0x14b   : > { %v3132_v18 = vadd.f32 -1.0, %v3772_v31  ;;  %v991_v36 = vpop.f32.mrb[38].mxu0  ;;  %v1329_v42 = vsel %vm1129_vm0, %v973_v50, %v3131_v32 }
 0x14c   : > { %v1201_v37 = vmul.f32 1.442695, %v989_v33  ;;  %v992_v39 = vadd.f32 %v991_v36, %v4626_v44  ;;  %v3370_v41 = vpop.f32.mrb[39].mxu0  ;;  %vm1133_vm5 = vcmp.gt.f32.partialorder %v989_v33, 0.0 }
 0x14d   : > { %v1330_v43 = vsel %vm1130_vm2, %v976_v56, %v3132_v18 }
 0x14e   : > { %3777 = vpow2.f32 %v1201_v37  ;;  %v1372_v17 = vpack.c.bf16 %v1330_v43, %v1329_v42  ;;  %v1203_v45 = vmul.f32 1.442695, %v992_v39  ;;  %vm1134_vm6 = vcmp.gt.f32.partialorder %v992_v39, 0.0 }
 0x150   : > { %v3774_v46 = vpop.eup %3773  ;;  %3779 = vpow2.f32 %v1203_v45  ;;  %2127 = vmatpush1.bf16.msra.mxu0 %v1372_v17  ;;  %3454 = vmatpush1.bf16.msra.mxu1 %v1372_v17  ;;  %v568_v45 = vpop.permute.xlu0 %567 }
 0x151   : > { %v996_v40 = vpop.f32.mrb[40].mxu0  ;;  %v3133_v47 = vadd.f32 -1.0, %v3774_v46  ;;  %2128 = vmatprep.subr.bf16.mxu0 %v3981_v4  ;;  %3439 = vmatprep.subr.bf16.mxu1 %v3981_v4 }
 0x152   : > { %v997_v48 = vadd.f32 %v996_v40, %v4651_v60  ;;  %v3373_v8 = vpop.f32.mrb[41].mxu0  ;;  %v3776_v44 = vpop.eup %3775 }
 0x153   : > { %v3134_v49 = vadd.f32 -1.0, %v3776_v44  ;;  %v999_v53 = vpop.f32.mrb[42].mxu0  ;;  %v1331_v58 = vsel %vm1131_vm3, %v981_v16, %v3133_v47  ;;  %v573_v8 = vpop.permute.xlu1 %572 }
 0x154   : > { %v1205_v52 = vmul.f32 1.442695, %v997_v48  ;;  %v1000_v54 = vadd.f32 %v999_v53, %v4640_v55  ;;  %v3374_v24 = vpop.f32.mrb[43].mxu0  ;;  %vm1135_vm7 = vcmp.gt.f32.partialorder %v997_v48, 0.0 }
 0x155   : > { %v1332_v59 = vsel %vm1132_vm4, %v984_v25, %v3134_v49 }
 0x156   : > { %3781 = vpow2.f32 %v1205_v52  ;;  %v1373_v50 = vpack.c.bf16 %v1332_v59, %v1331_v58  ;;  %v1207_v63 = vmul.f32 1.442695, %v1000_v54  ;;  %vm1136_vm8 = vcmp.gt.f32.partialorder %v1000_v54, 0.0 }
 0x158   : > { %v3778_v60 = vpop.eup %3777  ;;  %3783 = vpow2.f32 %v1207_v63  ;;  %2129 = vmatpush1.bf16.msra.mxu0 %v1373_v50  ;;  %3455 = vmatpush1.bf16.msra.mxu1 %v1373_v50 }
 0x159   : > { %v1004_v21 = vpop.f32.mrb[44].mxu0  ;;  %v3135_v57 = vadd.f32 -1.0, %v3778_v60  ;;  %2130 = vmatprep.subr.bf16.mxu0 %v3981_v4  ;;  %3440 = vmatprep.subr.bf16.mxu1 %v3981_v4  ;;  %v578_v60 = vpop.permute.xlu0 %577 }
 0x15a   : > { %v1005_v0 = vadd.f32 %v1004_v21, %v4671_v7  ;;  %v3377_v51 = vpop.f32.mrb[45].mxu0  ;;  %v3780_v55 = vpop.eup %3779 }
 0x15b   : > { %v3136_v56 = vadd.f32 -1.0, %v3780_v55  ;;  %v1007_v3 = vpop.f32.mrb[46].mxu0  ;;  %v1333_v12 = vsel %vm1133_vm5, %v989_v33, %v3135_v57 }
 0x15c   : > { %v1209_v2 = vmul.f32 1.442695, %v1005_v0  ;;  %v1008_v5 = vadd.f32 %v1007_v3, %v4669_v15  ;;  %v3378_v9 = vpop.f32.mrb[47].mxu0  ;;  %vm1137_vm9 = vcmp.gt.f32.partialorder %v1005_v0, 0.0 }
 0x15d   : > { %v1334_v28 = vsel %vm1134_vm6, %v992_v39, %v3136_v56  ;;  %v583_v56 = vpop.permute.xlu1 %582 }
 0x15e   : > { %3785 = vpow2.f32 %v1209_v2  ;;  %v1374_v13 = vpack.c.bf16 %v1334_v28, %v1333_v12  ;;  %v1211_v14 = vmul.f32 1.442695, %v1008_v5  ;;  %vm1138_vm10 = vcmp.gt.f32.partialorder %v1008_v5, 0.0 }
 0x160   : > { %v3782_v7 = vpop.eup %3781  ;;  %3787 = vpow2.f32 %v1211_v14  ;;  %2131 = vmatpush1.bf16.msra.mxu0 %v1374_v13  ;;  %3456 = vmatpush1.bf16.msra.mxu1 %v1374_v13 }
 0x161   : > { %v1012_v16 = vpop.f32.mrb[48].mxu0  ;;  %v3137_v19 = vadd.f32 -1.0, %v3782_v7  ;;  %2132 = vmatprep.subr.bf16.mxu0 %v3981_v4  ;;  %3441 = vmatprep.subr.bf16.mxu1 %v3981_v4 }
 0x162   : > { %v1013_v27 = vadd.f32 %v1012_v16, %v4694_v38  ;;  %v3381_v20 = vpop.f32.mrb[49].mxu0  ;;  %v3784_v15 = vpop.eup %3783 }
 0x163   : > { %v3138_v22 = vadd.f32 -1.0, %v3784_v15  ;;  %v1015_v25 = vpop.f32.mrb[50].mxu0  ;;  %v1335_v10 = vsel %vm1135_vm7, %v997_v48, %v3137_v19  ;;  %v588_v19 = vpop.permute.xlu0 %587 }
 0x164   : > { %v1213_v23 = vmul.f32 1.442695, %v1013_v27  ;;  %v1016_v26 = vadd.f32 %v1015_v25, %v4686_v62  ;;  %v3382_v11 = vpop.f32.mrb[51].mxu0  ;;  %vm1139_vm11 = vcmp.gt.f32.partialorder %v1013_v27, 0.0  ;;  %v593_v25 = vpop.permute.xlu1 %592 }
 0x165   : > { %v1336_v29 = vsel %vm1136_vm8, %v1000_v54, %v3138_v22 }
 0x166   : > { %3789 = vpow2.f32 %v1213_v23  ;;  %v1375_v1 = vpack.c.bf16 %v1336_v29, %v1335_v10  ;;  %v1215_v35 = vmul.f32 1.442695, %v1016_v26  ;;  %vm1140_vm12 = vcmp.gt.f32.partialorder %v1016_v26, 0.0 }
 0x168   : > { %v3786_v38 = vpop.eup %3785  ;;  %3791 = vpow2.f32 %v1215_v35  ;;  %2133 = vmatpush1.bf16.msra.mxu0 %v1375_v1  ;;  %3457 = vmatpush1.bf16.msra.mxu1 %v1375_v1 }
 0x169   : > { %v1020_v30 = vpop.f32.mrb[52].mxu0  ;;  %v3139_v32 = vadd.f32 -1.0, %v3786_v38  ;;  %2134 = vmatprep.subr.bf16.mxu0 %v3981_v4  ;;  %3442 = vmatprep.subr.bf16.mxu1 %v3981_v4 }
 0x16a   : > { %v4760_v33 = vadd.f32 %v1020_v30, %v4715_v6  ;;  %v3385_v34 = vpop.f32.mrb[53].mxu0  ;;  %v3788_v62 = vpop.eup %3787 }
 0x16b   : > { %v3140_v31 = vadd.f32 -1.0, %v3788_v62  ;;  %v1023_v37 = vpop.f32.mrb[54].mxu0  ;;  %v1337_v41 = vsel %vm1137_vm9, %v1005_v0, %v3139_v32  ;;  %v598_v34 = vpop.permute.xlu0 %597 }
 0x16c   : > { %v1217_v18 = vmul.f32 1.442695, %v4760_v33  ;;  %v1024_v36 = vadd.f32 %v1023_v37, %v4713_v61  ;;  %v3386_v39 = vpop.f32.mrb[55].mxu0  ;;  %vm1141_vm13 = vcmp.gt.f32.partialorder %v4760_v33, 0.0 }
 0x16d   : > { %v1338_v42 = vsel %vm1138_vm10, %v1008_v5, %v3140_v31  ;;  %v603_v39 = vpop.permute.xlu1 %602 }
 0x16e   : > { %3793 = vpow2.f32 %v1217_v18  ;;  %v1376_v6 = vpack.c.bf16 %v1338_v42, %v1337_v41  ;;  %v1219_v43 = vmul.f32 1.442695, %v1024_v36  ;;  %vm1142_vm14 = vcmp.gt.f32.partialorder %v1024_v36, 0.0 }
 0x170   : > { %v3790_v17 = vpop.eup %3789  ;;  %3795 = vpow2.f32 %v1219_v43  ;;  %2135 = vmatpush1.bf16.msra.mxu0 %v1376_v6  ;;  %3458 = vmatpush1.bf16.msra.mxu1 %v1376_v6 }
 0x171   : > { %v1028_v46 = vpop.f32.mrb[56].mxu0  ;;  %v3141_v40 = vadd.f32 -1.0, %v3790_v17  ;;  %2136 = vmatprep.subr.bf16.mxu0 %v3981_v4  ;;  %3443 = vmatprep.subr.bf16.mxu1 %v3981_v4 }
 0x172   : > { %v4766_v47 = vadd.f32 %v1028_v46, %v568_v45  ;;  %v3389_v48 = vpop.f32.mrb[57].mxu0  ;;  %v3792_v61 = vpop.eup %3791 }
 0x173   : > { %v3142_v44 = vadd.f32 -1.0, %v3792_v61  ;;  %v1031_v52 = vpop.f32.mrb[58].mxu0  ;;  %v1339_v24 = vsel %vm1139_vm11, %v1013_v27, %v3141_v40  ;;  %v3627_v61 = vld [vmem:[%s5327_s3 + $0x140] ss:$16 sps:$4 sm:$0xff]  }
 0x174   : > { %v1221_v49 = vmul.f32 1.442695, %v4766_v47  ;;  %v1032_v53 = vadd.f32 %v1031_v52, %v573_v8  ;;  %v3390_v54 = vpop.f32.mrb[59].mxu0  ;;  %vm1143_vm15 = vcmp.gt.f32.partialorder %v4766_v47, 0.0  ;;  %v3630_v8 = vld [vmem:[%s5327_s3] ss:$16 sps:$4 sm:$0xff]  }
 0x175   : > { %v1340_v58 = vsel %vm1140_vm12, %v1016_v26, %v3142_v44  ;;  %v608_v44 = vpop.permute.xlu0 %607  ;;  %v3633_v52 = vld [vmem:[%s5327_s3 + $0x24] ss:$16 sps:$4 sm:$0xff]  }
 0x176   : > { %3797 = vpow2.f32 %v1221_v49  ;;  %v1377_v59 = vpack.c.bf16 %v1340_v58, %v1339_v24  ;;  %v1223_v50 = vmul.f32 1.442695, %v1032_v53  ;;  %vm1144_vm0 = vcmp.gt.f32.partialorder %v1032_v53, 0.0 }
 0x178   : > { %v3794_v63 = vpop.eup %3793  ;;  %3799 = vpow2.f32 %v1223_v50  ;;  %2137 = vmatpush1.bf16.msra.mxu0 %v1377_v59  ;;  %3459 = vmatpush1.bf16.msra.mxu1 %v1377_v59  ;;  %v613_v50 = vpop.permute.xlu1 %612 }
 0x179   : > { %v1036_v21 = vpop.f32.mrb[60].mxu0  ;;  %v3143_v57 = vadd.f32 -1.0, %v3794_v63  ;;  %2138 = vmatprep.subr.bf16.mxu0 %v3981_v4  ;;  %3444 = vmatprep.subr.bf16.mxu1 %v3981_v4 }
 0x17a   : > { %v4771_v0 = vadd.f32 %v1036_v21, %v578_v60  ;;  %v3393_v51 = vpop.f32.mrb[61].mxu0  ;;  %v3796_v55 = vpop.eup %3795 }
 0x17b   : > { %v3144_v2 = vadd.f32 -1.0, %v3796_v55  ;;  %v1039_v5 = vpop.f32.mrb[62].mxu0  ;;  %v1341_v28 = vsel %vm1141_vm13, %v4760_v33, %v3143_v57 }
 0x17c   : > { %v1225_v3 = vmul.f32 1.442695, %v4771_v0  ;;  %v1040_v9 = vadd.f32 %v1039_v5, %v583_v56  ;;  %v3394_v12 = vpop.f32.mrb[63].mxu0  ;;  %vm1145_vm2 = vcmp.gt.f32.partialorder %v4771_v0, 0.0  ;;  %v3637_v5 = vld [vmem:[%s5327_s3 + $0x20] ss:$16 sps:$4 sm:$0xff]  }
 0x17d   : > { %v1342_v13 = vsel %vm1142_vm14, %v1024_v36, %v3144_v2  ;;  %v618_v12 = vpop.permute.xlu0 %617 }
 0x17e   : > { %3801 = vpow2.f32 %v1225_v3  ;;  %v1378_v14 = vpack.c.bf16 %v1342_v13, %v1341_v28  ;;  %v1227_v7 = vmul.f32 1.442695, %v1040_v9  ;;  %vm1146_vm3 = vcmp.gt.f32.partialorder %v1040_v9, 0.0  ;;  %v3639_v13 = vld [vmem:[%s5327_s3 + $0x44] ss:$16 sps:$4 sm:$0xff]  }
 0x180   : > { %v3798_v16 = vpop.eup %3797  ;;  %3803 = vpow2.f32 %v1227_v7  ;;  %2139 = vmatpush1.bf16.msra.mxu0 %v1378_v14  ;;  %3460 = vmatpush1.bf16.msra.mxu1 %v1378_v14  ;;  %v3641_v14 = vld [vmem:[%s5327_s3 + $0x184] ss:$16 sps:$4 sm:$0xff]  }
 0x181   : > { %v1044_v27 = vpop.f32.mrb[64].mxu0  ;;  %v3145_v20 = vadd.f32 -1.0, %v3798_v16  ;;  %2140 = vmatprep.subr.bf16.mxu0 %v3981_v4  ;;  %3445 = vmatprep.subr.bf16.mxu1 %v3981_v4 }
 0x182   : > { %v4778_v15 = vadd.f32 %v1044_v27, %v588_v19  ;;  %v3397_v22 = vpop.f32.mrb[65].mxu0  ;;  %v3800_v23 = vpop.eup %3799 }
 0x183   : > { %v3146_v26 = vadd.f32 -1.0, %v3800_v23  ;;  %v1047_v10 = vpop.f32.mrb[66].mxu0  ;;  %v1343_v35 = vsel %vm1143_vm15, %v4766_v47, %v3145_v20  ;;  %v623_v20 = vpop.permute.xlu1 %622 }
 0x184   : > { %v1229_v11 = vmul.f32 1.442695, %v4778_v15  ;;  %v1048_v29 = vadd.f32 %v1047_v10, %v593_v25  ;;  %v3398_v1 = vpop.f32.mrb[67].mxu0  ;;  %vm1147_vm4 = vcmp.gt.f32.partialorder %v4778_v15, 0.0 }
 0x185   : > { %v1344_v38 = vsel %vm1144_vm0, %v1032_v53, %v3146_v26  ;;  %v3635_v53 = vld [vmem:[%s5327_s3 + $0x164] ss:$16 sps:$4 sm:$0xff]  }
 0x186   : > { %3805 = vpow2.f32 %v1229_v11  ;;  %v1379_v30 = vpack.c.bf16 %v1344_v38, %v1343_v35  ;;  %v1231_v32 = vmul.f32 1.442695, %v1048_v29  ;;  %vm1148_vm5 = vcmp.gt.f32.partialorder %v1048_v29, 0.0  ;;  %v3643_v38 = vld [vmem:[%s5327_s3 + $0x40] ss:$16 sps:$4 sm:$0xff]  }
 0x188   : > { %v3802_v33 = vpop.eup %3801  ;;  %3807 = vpow2.f32 %v1231_v32  ;;  %2141 = vmatpush1.bf16.msra.mxu0 %v1379_v30  ;;  %3461 = vmatpush1.bf16.msra.mxu1 %v1379_v30  ;;  %v3644_v30 = vld [vmem:[%s5327_s3 + $0x180] ss:$16 sps:$4 sm:$0xff]   ;;  %v628_v32 = vpop.permute.xlu0 %627 }
 0x189   : > { %v1052_v62 = vpop.f32.mrb[68].mxu0  ;;  %v3147_v31 = vadd.f32 -1.0, %v3802_v33  ;;  %2142 = vmatprep.subr.bf16.mxu0 %v3981_v4  ;;  %3446 = vmatprep.subr.bf16.mxu1 %v3981_v4 }
 0x18a   : > { %v4785_v18 = vadd.f32 %v1052_v62, %v598_v34  ;;  %v3401_v37 = vpop.f32.mrb[69].mxu0  ;;  %v3804_v36 = vpop.eup %3803  ;;  %v3645_v34 = vld [vmem:[%s5327_s3 + $0x64] ss:$16 sps:$4 sm:$0xff]  }
 0x18b   : > { %v3148_v41 = vadd.f32 -1.0, %v3804_v36  ;;  %v1055_v6 = vpop.f32.mrb[70].mxu0  ;;  %v1345_v45 = vsel %vm1145_vm2, %v4771_v0, %v3147_v31  ;;  %v3647_v62 = vld [vmem:[%s5327_s3 + $0x1a4] ss:$16 sps:$4 sm:$0xff]  }
 0x18c   : > { %v1233_v42 = vmul.f32 1.442695, %v4785_v18  ;;  %v4791_v43 = vadd.f32 %v1055_v6, %v603_v39  ;;  %v3402_v17 = vpop.f32.mrb[71].mxu0  ;;  %vm1149_vm6 = vcmp.gt.f32.partialorder %v4785_v18, 0.0  ;;  %v633_v39 = vpop.permute.xlu1 %632 }
 0x18d   : > { %v1346_v46 = vsel %vm1146_vm3, %v1040_v9, %v3148_v41  ;;  %v3638_v9 = vld [vmem:[%s5327_s3 + $0x160] ss:$16 sps:$4 sm:$0xff]  }
 0x18e   : > { %3809 = vpow2.f32 %v1233_v42  ;;  %v1380_v40 = vpack.c.bf16 %v1346_v46, %v1345_v45  ;;  %v1235_v47 = vmul.f32 1.442695, %v4791_v43  ;;  %vm1150_vm7 = vcmp.gt.f32.partialorder %v4791_v43, 0.0 }
 0x190   : > { %v3806_v48 = vpop.eup %3805  ;;  %3811 = vpow2.f32 %v1235_v47  ;;  %2143 = vmatpush1.bf16.msra.mxu0 %v1380_v40  ;;  %3462 = vmatpush1.bf16.msra.mxu1 %v1380_v40 }
 0x191   : > { %v1060_v49 = vpop.f32.mrb[72].mxu0  ;;  %v3149_v54 = vadd.f32 -1.0, %v3806_v48  ;;  %2297 = vmatprep.subr.bf16.mxu1 %v3981_v4 }
 0x192   : > { %v4807_v24 = vadd.f32 %v1060_v49, %v608_v44  ;;  %v3405_v58 = vpop.f32.mrb[73].mxu0  ;;  %v3808_v59 = vpop.eup %3807 }
 0x193   : > { %v3150_v63 = vadd.f32 -1.0, %v3808_v59  ;;  %v1063_v21 = vpop.f32.mrb[74].mxu0  ;;  %2145 = vmatmul.mubr.bf16.vlgmr.msra.gmra.mrb[100].mxu0 %v3630_v8  ;;  %2225 = vmatmul.mubr.bf16.vlgmr.msra.gmra.mrb[0].mxu1 %v3627_v61  ;;  %v1347_v51 = vsel %vm1147_vm4, %v4778_v15, %v3149_v54  ;;  %v3649_v61 = vld [vmem:[%s5327_s3 + $0x60] ss:$16 sps:$4 sm:$0xff]   ;;  %v638_v44 = vpop.permute.xlu0 %637 }
 0x194   : > { %v1237_v60 = vmul.f32 1.442695, %v4807_v24  ;;  %v4812_v57 = vadd.f32 %v1063_v21, %v613_v50  ;;  %v3406_v0 = vpop.f32.mrb[75].mxu0  ;;  %2152 = vmatprep.mubr.bf16.mxu0 %v3633_v52  ;;  %2232 = vmatprep.mubr.bf16.mxu1 %v3635_v53  ;;  %vm1151_vm8 = vcmp.gt.f32.partialorder %v4807_v24, 0.0  ;;  %v3650_v8 = vld [vmem:[%s5327_s3 + $0x1a0] ss:$16 sps:$4 sm:$0xff]   ;;  %v643_v50 = vpop.permute.xlu1 %642 }
 0x195   : > { %v1348_v55 = vsel %vm1148_vm5, %v1048_v29, %v3150_v63  ;;  %v3651_v52 = vld [vmem:[%s5327_s3 + $0x84] ss:$16 sps:$4 sm:$0xff]  }
 0x196   : > { %3813 = vpow2.f32 %v1237_v60  ;;  %v1381_v56 = vpack.c.bf16 %v1348_v55, %v1347_v51  ;;  %v1239_v2 = vmul.f32 1.442695, %v4812_v57  ;;  %vm1152_vm9 = vcmp.gt.f32.partialorder %v4812_v57, 0.0  ;;  %v3653_v53 = vld [vmem:[%s5327_s3 + $0x1c4] ss:$16 sps:$4 sm:$0xff]  }
 0x198   : > { %v3810_v3 = vpop.eup %3809  ;;  %3815 = vpow2.f32 %v1239_v2  ;;  %2298 = vmatpush1.bf16.msra.mxu1 %v1381_v56 }
 0x199   : > { %v1068_v28 = vpop.f32.mrb[76].mxu0  ;;  %v3151_v7 = vadd.f32 -1.0, %v3810_v3  ;;  %2299 = vmatprep.subr.bf16.mxu1 %v3981_v4 }
 0x19a   : > { %v4828_v16 = vadd.f32 %v1068_v28, %v618_v12  ;;  %v3409_v19 = vpop.f32.mrb[77].mxu0  ;;  %v3812_v27 = vpop.eup %3811 }
 0x19b   : > { %v3152_v15 = vadd.f32 -1.0, %v3812_v27  ;;  %v1071_v23 = vpop.f32.mrb[78].mxu0  ;;  %2153 = vmatmul.mubr.bf16.gmra.mrb[104].mxu0 %v3637_v5  ;;  %2233 = vmatmul.mubr.bf16.gmra.mrb[4].mxu1 %v3638_v9  ;;  %v1349_v11 = vsel %vm1149_vm6, %v4785_v18, %v3151_v7  ;;  %v3655_v5 = vld [vmem:[%s5327_s3 + $0x80] ss:$16 sps:$4 sm:$0xff]   ;;  %v648_v12 = vpop.permute.xlu0 %647  ;;  %v3659_v7 = vld [vmem:[%s5327_s3 + $0x1e4] ss:$16 sps:$4 sm:$0xff]  }
 0x19c   : > { %v1241_v22 = vmul.f32 1.442695, %v4828_v16  ;;  %v4834_v25 = vadd.f32 %v1071_v23, %v623_v20  ;;  %v3410_v26 = vpop.f32.mrb[79].mxu0  ;;  %2160 = vmatprep.mubr.bf16.mxu0 %v3639_v13  ;;  %2240 = vmatprep.mubr.bf16.mxu1 %v3641_v14  ;;  %vm1153_vm10 = vcmp.gt.f32.partialorder %v4828_v16, 0.0  ;;  %v3656_v9 = vld [vmem:[%s5327_s3 + $0x1c0] ss:$16 sps:$4 sm:$0xff]   ;;  %v653_v20 = vpop.permute.xlu1 %652 }
 0x19d   : > { %v1350_v10 = vsel %vm1150_vm7, %v4791_v43, %v3152_v15  ;;  %v3657_v14 = vld [vmem:[%s5327_s3 + $0xa4] ss:$16 sps:$4 sm:$0xff]  }
 0x19e   : > { %3817 = vpow2.f32 %v1241_v22  ;;  %v1382_v29 = vpack.c.bf16 %v1350_v10, %v1349_v11  ;;  %v1243_v1 = vmul.f32 1.442695, %v4834_v25  ;;  %vm1154_vm11 = vcmp.gt.f32.partialorder %v4834_v25, 0.0 }
 0x1a0   : > { %v3814_v35 = vpop.eup %3813  ;;  %3819 = vpow2.f32 %v1243_v1  ;;  %2300 = vmatpush1.bf16.msra.mxu1 %v1382_v29 }
 0x1a1   : > { %v1076_v33 = vpop.f32.mrb[80].mxu0  ;;  %v3153_v31 = vadd.f32 -1.0, %v3814_v35  ;;  %2301 = vmatprep.subr.bf16.mxu1 %v3981_v4 }
 0x1a2   : > { %v4851_v18 = vadd.f32 %v1076_v33, %v628_v32  ;;  %v3413_v37 = vpop.f32.mrb[81].mxu0  ;;  %v3816_v36 = vpop.eup %3815 }
 0x1a3   : > { %v1079_v41 = vpop.f32.mrb[82].mxu0  ;;  %v3154_v42 = vadd.f32 -1.0, %v3816_v36  ;;  %2161 = vmatmul.mubr.bf16.gmra.mrb[108].mxu0 %v3643_v38  ;;  %2241 = vmatmul.mubr.bf16.gmra.mrb[8].mxu1 %v3644_v30  ;;  %v1351_v45 = vsel %vm1151_vm8, %v4807_v24, %v3153_v31  ;;  %v3661_v38 = vld [vmem:[%s5327_s3 + $0xa0] ss:$16 sps:$4 sm:$0xff]   ;;  %v658_v32 = vpop.permute.xlu0 %657  ;;  %v3665_v31 = vld [vmem:[%s5327_s3 + $0x204] ss:$16 sps:$4 sm:$0xff]  }
 0x1a4   : > { %v1245_v6 = vmul.f32 1.442695, %v4851_v18  ;;  %v4855_v43 = vadd.f32 %v1079_v41, %v633_v39  ;;  %v3414_v17 = vpop.f32.mrb[83].mxu0  ;;  %2168 = vmatprep.mubr.bf16.mxu0 %v3645_v34  ;;  %2248 = vmatprep.mubr.bf16.mxu1 %v3647_v62  ;;  %vm1155_vm12 = vcmp.gt.f32.partialorder %v4851_v18, 0.0  ;;  %v3662_v30 = vld [vmem:[%s5327_s3 + $0x1e0] ss:$16 sps:$4 sm:$0xff]   ;;  %v663_v39 = vpop.permute.xlu1 %662 }
 0x1a5   : > { %v1352_v46 = vsel %vm1152_vm9, %v4812_v57, %v3154_v42  ;;  %v3663_v62 = vld [vmem:[%s5327_s3 + $0xc4] ss:$16 sps:$4 sm:$0xff]  }
 0x1a6   : > { %3821 = vpow2.f32 %v1245_v6  ;;  %v1247_v40 = vmul.f32 1.442695, %v4855_v43  ;;  %v1383_v47 = vpack.c.bf16 %v1352_v46, %v1351_v45  ;;  %vm1156_vm13 = vcmp.gt.f32.partialorder %v4855_v43, 0.0 }
 0x1a8   : > { %v3818_v48 = vpop.eup %3817  ;;  %3823 = vpow2.f32 %v1247_v40  ;;  %2302 = vmatpush1.bf16.msra.mxu1 %v1383_v47 }
 0x1a9   : > { %v1084_v49 = vpop.f32.mrb[84].mxu0  ;;  %v3155_v54 = vadd.f32 -1.0, %v3818_v48  ;;  %2303 = vmatprep.subr.bf16.mxu1 %v3981_v4 }
 0x1aa   : > { %v4874_v24 = vadd.f32 %v1084_v49, %v638_v44  ;;  %v3417_v58 = vpop.f32.mrb[85].mxu0  ;;  %v3820_v59 = vpop.eup %3819 }
 0x1ab   : > { %v1087_v63 = vpop.f32.mrb[86].mxu0  ;;  %v3156_v60 = vadd.f32 -1.0, %v3820_v59  ;;  %2169 = vmatmul.mubr.bf16.gmra.mrb[112].mxu0 %v3649_v61  ;;  %2249 = vmatmul.mubr.bf16.gmra.mrb[12].mxu1 %v3650_v8  ;;  %v1353_v51 = vsel %vm1153_vm10, %v4828_v16, %v3155_v54  ;;  %v3667_v61 = vld [vmem:[%s5327_s3 + $0xc0] ss:$16 sps:$4 sm:$0xff]   ;;  %v668_v44 = vpop.permute.xlu0 %667  ;;  %v3671_v54 = vld [vmem:[%s5327_s3 + $0x224] ss:$16 sps:$4 sm:$0xff]  }
 0x1ac   : > { %v1249_v21 = vmul.f32 1.442695, %v4874_v24  ;;  %v4878_v57 = vadd.f32 %v1087_v63, %v643_v50  ;;  %v3418_v0 = vpop.f32.mrb[87].mxu0  ;;  %2176 = vmatprep.mubr.bf16.mxu0 %v3651_v52  ;;  %2256 = vmatprep.mubr.bf16.mxu1 %v3653_v53  ;;  %vm1157_vm14 = vcmp.gt.f32.partialorder %v4874_v24, 0.0  ;;  %v3668_v8 = vld [vmem:[%s5327_s3 + $0x200] ss:$16 sps:$4 sm:$0xff]   ;;  %v673_v50 = vpop.permute.xlu1 %672 }
 0x1ad   : > { %v1354_v55 = vsel %vm1154_vm11, %v4834_v25, %v3156_v60  ;;  %v3669_v53 = vld [vmem:[%s5327_s3 + $0xe4] ss:$16 sps:$4 sm:$0xff]  }
 0x1ae   : > { %3825 = vpow2.f32 %v1249_v21  ;;  %v1251_v56 = vmul.f32 1.442695, %v4878_v57  ;;  %v1384_v2 = vpack.c.bf16 %v1354_v55, %v1353_v51  ;;  %vm1158_vm15 = vcmp.gt.f32.partialorder %v4878_v57, 0.0 }
 0x1b0   : > { %v3822_v3 = vpop.eup %3821  ;;  %3827 = vpow2.f32 %v1251_v56  ;;  %2304 = vmatpush1.bf16.msra.mxu1 %v1384_v2 }
 0x1b1   : > { %v3157_v28 = vadd.f32 -1.0, %v3822_v3  ;;  %v1092_v13 = vpop.f32.mrb[88].mxu0  ;;  %2305 = vmatprep.subr.bf16.mxu1 %v3981_v4 }
 0x1b2   : > { %v3824_v16 = vpop.eup %3823  ;;  %v4897_v19 = vadd.f32 %v1092_v13, %v648_v12  ;;  %v3421_v27 = vpop.f32.mrb[89].mxu0  ;;  %v3677_v13 = vld [vmem:[%s5327_s3 + $0x244] ss:$16 sps:$4 sm:$0xff]  }
 0x1b3   : > { %v3158_v15 = vadd.f32 -1.0, %v3824_v16  ;;  %v1095_v22 = vpop.f32.mrb[90].mxu0  ;;  %2177 = vmatmul.mubr.bf16.gmra.mrb[116].mxu0 %v3655_v5  ;;  %2257 = vmatmul.mubr.bf16.gmra.mrb[16].mxu1 %v3656_v9  ;;  %v1355_v11 = vsel %vm1155_vm12, %v4851_v18, %v3157_v28  ;;  %v3673_v5 = vld [vmem:[%s5327_s3 + $0xe0] ss:$16 sps:$4 sm:$0xff]   ;;  %v3675_v28 = vld [vmem:[%s5327_s3 + $0x104] ss:$16 sps:$4 sm:$0xff]  }
 0x1b4   : > { %v1253_v23 = vmul.f32 1.442695, %v4897_v19  ;;  %v4903_v25 = vadd.f32 %v1095_v22, %v653_v20  ;;  %v3422_v26 = vpop.f32.mrb[91].mxu0  ;;  %2184 = vmatprep.mubr.bf16.mxu0 %v3657_v14  ;;  %2264 = vmatprep.mubr.bf16.mxu1 %v3659_v7  ;;  %vm1159_vm0 = vcmp.gt.f32.partialorder %v4897_v19, 0.0  ;;  %v3674_v9 = vld [vmem:[%s5327_s3 + $0x220] ss:$16 sps:$4 sm:$0xff]  }
 0x1b5   : > { %v1356_v10 = vsel %vm1156_vm13, %v4855_v43, %v3158_v15  ;;  %v3679_v15 = vld [vmem:[%s5327_s3 + $0x100] ss:$16 sps:$4 sm:$0xff]   ;;  %v3685_v26 = vld [vmem:[%s5327_s3 + $0xc] ss:$16 sps:$4 sm:$0xff]  }
 0x1b6   : > { %v1385_v29 = vpack.c.bf16 %v1356_v10, %v1355_v11  ;;  %3829 = vpow2.f32 %v1253_v23  ;;  %v1255_v1 = vmul.f32 1.442695, %v4903_v25  ;;  %vm1160_vm2 = vcmp.gt.f32.partialorder %v4903_v25, 0.0  ;;  %v3680_v22 = vld [vmem:[%s5327_s3 + $0x240] ss:$16 sps:$4 sm:$0xff]  }
 0x1b8   : > { %v3826_v35 = vpop.eup %3825  ;;  %3831 = vpow2.f32 %v1255_v1  ;;  %2306 = vmatpush1.bf16.msra.mxu1 %v1385_v29 }
 0x1b9   : > { %v3159_v33 = vadd.f32 -1.0, %v3826_v35  ;;  %v1100_v34 = vpop.f32.mrb[92].mxu0  ;;  %2307 = vmatprep.subr.bf16.mxu1 %v3981_v4  ;;  %v3683_v35 = vld [vmem:[%s5327_s3 + $0x8] ss:$16 sps:$4 sm:$0xff]  }
 0x1ba   : > { %v3828_v18 = vpop.eup %3827  ;;  %v4921_v37 = vadd.f32 %v1100_v34, %v658_v32  ;;  %v3425_v36 = vpop.f32.mrb[93].mxu0  ;;  %v3689_v32 = vld [vmem:[%s5327_s3 + $0x28] ss:$16 sps:$4 sm:$0xff]  }
 0x1bb   : > { %v3160_v41 = vadd.f32 -1.0, %v3828_v18  ;;  %v1103_v42 = vpop.f32.mrb[94].mxu0  ;;  %2185 = vmatmul.mubr.bf16.gmra.mrb[120].mxu0 %v3661_v38  ;;  %2265 = vmatmul.mubr.bf16.gmra.mrb[20].mxu1 %v3662_v30  ;;  %v1357_v45 = vsel %vm1157_vm14, %v4874_v24, %v3159_v33  ;;  %v3686_v38 = vld [vmem:[%s5327_s3 + $0x120] ss:$16 sps:$4 sm:$0xff]   ;;  %v3687_v30 = vld [vmem:[%s5327_s3 + $0x2c] ss:$16 sps:$4 sm:$0xff]  }
 0x1bc   : > { %v1257_v6 = vmul.f32 1.442695, %v4921_v37  ;;  %v1104_v43 = vadd.f32 %v1103_v42, %v663_v39  ;;  %v3426_v17 = vpop.f32.mrb[95].mxu0  ;;  %2192 = vmatprep.mubr.bf16.mxu0 %v3663_v62  ;;  %2272 = vmatprep.mubr.bf16.mxu1 %v3665_v31  ;;  %vm1161_vm3 = vcmp.gt.f32.partialorder %v4921_v37, 0.0  ;;  %v3690_v33 = vld [vmem:[%s5327_s3 + $0x4c] ss:$16 sps:$4 sm:$0xff]  }
 0x1bd   : > { %v1358_v46 = vsel %vm1158_vm15, %v4878_v57, %v3160_v41  ;;  %v3692_v34 = vld [vmem:[%s5327_s3 + $0x48] ss:$16 sps:$4 sm:$0xff]   ;;  %v3693_v62 = vld [vmem:[%s5327_s3 + $0x6c] ss:$16 sps:$4 sm:$0xff]  }
 0x1be   : > { %v1386_v40 = vpack.c.bf16 %v1358_v46, %v1357_v45  ;;  %3833 = vpow2.f32 %v1257_v6  ;;  %v1259_v47 = vmul.f32 1.442695, %v1104_v43  ;;  %vm1162_vm4 = vcmp.gt.f32.partialorder %v1104_v43, 0.0  ;;  %v3695_v31 = vld [vmem:[%s5327_s3 + $0x68] ss:$16 sps:$4 sm:$0xff]  }
 0x1bf   : > { %v3696_v18 = vld [vmem:[%s5327_s3 + $0x8c] ss:$16 sps:$4 sm:$0xff]   ;;  %v3701_v39 = vld [vmem:[%s5327_s3 + $0xa8] ss:$16 sps:$4 sm:$0xff]  }
 0x1c0   : > { %v3830_v48 = vpop.eup %3829  ;;  %3835 = vpow2.f32 %v1259_v47  ;;  %2308 = vmatpush1.bf16.msra.mxu1 %v1386_v40  ;;  %v3699_v36 = vld [vmem:[%s5327_s3 + $0xac] ss:$16 sps:$4 sm:$0xff]   ;;  %v3704_v42 = vld [vmem:[%s5327_s3 + $0xc8] ss:$16 sps:$4 sm:$0xff]  }
 0x1c1   : > { %v3161_v49 = vadd.f32 -1.0, %v3830_v48  ;;  %v1108_v52 = vpop.f32.mrb[96].mxu0  ;;  %2309 = vmatprep.subr.bf16.mxu1 %v3981_v4  ;;  %v3702_v41 = vld [vmem:[%s5327_s3 + $0xcc] ss:$16 sps:$4 sm:$0xff]   ;;  %v3710_v45 = vld [vmem:[%s5327_s3 + $0x108] ss:$16 sps:$4 sm:$0xff]  }
 0x1c2   : > { %v3832_v24 = vpop.eup %3831  ;;  %v1109_v58 = vadd.f32 %v1108_v52, %v668_v44  ;;  %v3429_v59 = vpop.f32.mrb[97].mxu0  ;;  %v3705_v6 = vld [vmem:[%s5327_s3 + $0xec] ss:$16 sps:$4 sm:$0xff]   ;;  %v3713_v40 = vld [vmem:[%s5327_s3 + $0x128] ss:$16 sps:$4 sm:$0xff]  }
 0x1c3   : > { %v3162_v63 = vadd.f32 -1.0, %v3832_v24  ;;  %v1111_v60 = vpop.f32.mrb[98].mxu0  ;;  %2193 = vmatmul.mubr.bf16.gmra.mrb[124].mxu0 %v3667_v61  ;;  %2273 = vmatmul.mubr.bf16.gmra.mrb[24].mxu1 %v3668_v8  ;;  %v1359_v51 = vsel %vm1159_vm0, %v4897_v19, %v3161_v49  ;;  %v3708_v17 = vld [vmem:[%s5327_s3 + $0x10c] ss:$16 sps:$4 sm:$0xff]   ;;  %v3716_v48 = vld [vmem:[%s5327_s3 + $0x148] ss:$16 sps:$4 sm:$0xff]   ;;  %v5082_v59 = vpop.permute.xlu0 %1506 }
 0x1c4   : > { %v1261_v21 = vmul.f32 1.442695, %v1109_v58  ;;  %v1112_v57 = vadd.f32 %v1111_v60, %v673_v50  ;;  %v3430_v0 = vpop.f32.mrb[99].mxu0  ;;  %2200 = vmatprep.mubr.bf16.mxu0 %v3669_v53  ;;  %2280 = vmatprep.mubr.bf16.mxu1 %v3671_v54  ;;  %vm1163_vm5 = vcmp.gt.f32.partialorder %v1109_v58, 0.0  ;;  %v3711_v46 = vld [vmem:[%s5327_s3 + $0x12c] ss:$16 sps:$4 sm:$0xff]   ;;  %v5090_v60 = vpop.permute.xlu1 %1511 }
 0x1c5   : > { %v1360_v55 = vsel %vm1160_vm2, %v4903_v25, %v3162_v63  ;;  %v3681_v25 = vld [vmem:[%s5327_s3 + $0x124] ss:$16 sps:$4 sm:$0xff]   ;;  %v3714_v47 = vld [vmem:[%s5327_s3 + $0x14c] ss:$16 sps:$4 sm:$0xff]   ;;  %v3719_v8 = vld [vmem:[%s5327_s3 + $0x168] ss:$16 sps:$4 sm:$0xff]  }
 0x1c6   : > { %v1387_v56 = vpack.c.bf16 %v1360_v55, %v1359_v51  ;;  %3837 = vpow2.f32 %v1261_v21  ;;  %v1263_v2 = vmul.f32 1.442695, %v1112_v57  ;;  %vm1164_vm6 = vcmp.gt.f32.partialorder %v1112_v57, 0.0  ;;  %v3717_v61 = vld [vmem:[%s5327_s3 + $0x16c] ss:$16 sps:$4 sm:$0xff]  }
 0x1c7   : > { %v3720_v44 = vld [vmem:[%s5327_s3 + $0x18c] ss:$16 sps:$4 sm:$0xff]   ;;  %v3722_v49 = vld [vmem:[%s5327_s3 + $0x188] ss:$16 sps:$4 sm:$0xff]   ;;  %v5092_v21 = vpop.permute.xlu0 %1516 }
 0x1c8   : > { %v3834_v3 = vpop.eup %3833  ;;  %3839 = vpow2.f32 %v1263_v2  ;;  %2310 = vmatpush1.bf16.msra.mxu1 %v1387_v56  ;;  %v3723_v52 = vld [vmem:[%s5327_s3 + $0x1ac] ss:$16 sps:$4 sm:$0xff]   ;;  %v3725_v53 = vld [vmem:[%s5327_s3 + $0x1a8] ss:$16 sps:$4 sm:$0xff]   ;;  %v5098_v0 = vpop.permute.xlu1 %1521 }
 0x1c9   : > { %v3163_v12 = vadd.f32 -1.0, %v3834_v3  ;;  %2311 = vmatprep.subr.bf16.mxu1 %v3981_v4  ;;  %v3726_v54 = vld [vmem:[%s5327_s3 + $0x1cc] ss:$16 sps:$4 sm:$0xff]   ;;  %v3728_v24 = vld [vmem:[%s5327_s3 + $0x1c8] ss:$16 sps:$4 sm:$0xff]  }
 0x1ca   : > { %v3836_v14 = vpop.eup %3835  ;;  %v3731_v50 = vld [vmem:[%s5327_s3 + $0x1e8] ss:$16 sps:$4 sm:$0xff]   ;;  %v3732_v63 = vld [vmem:[%s5327_s3 + $0x20c] ss:$16 sps:$4 sm:$0xff]  }
 0x1cb   : > { %v3164_v7 = vadd.f32 -1.0, %v3836_v14  ;;  %2201 = vmatmul.mubr.bf16.gmra.mrb[128].mxu0 %v3673_v5  ;;  %2281 = vmatmul.mubr.bf16.gmra.mrb[28].mxu1 %v3674_v9  ;;  %v1361_v16 = vsel %vm1161_vm3, %v4921_v37, %v3163_v12  ;;  %v3698_v37 = vld [vmem:[%s5327_s3 + $0x88] ss:$16 sps:$4 sm:$0xff]   ;;  %v3735_v51 = vld [vmem:[%s5327_s3 + $0x22c] ss:$16 sps:$4 sm:$0xff]   ;;  %v5103_v55 = vpop.permute.xlu0 %1526 }
 0x1cc   : > { %2208 = vmatprep.mubr.bf16.mxu0 %v3675_v28  ;;  %2288 = vmatprep.mubr.bf16.mxu1 %v3677_v13  ;;  %v5106_v56 = vpop.permute.xlu1 %1531  ;;  %v3737_v3 = vld [vmem:[%s5327_s3 + $0x228] ss:$16 sps:$4 sm:$0xff]   ;;  %v3738_v5 = vld [vmem:[%s5327_s3 + $0x24c] ss:$16 sps:$4 sm:$0xff]  }
 0x1cd   : > { %v1362_v19 = vsel %vm1162_vm4, %v1104_v43, %v3164_v7  ;;  %v3707_v43 = vld [vmem:[%s5327_s3 + $0xe8] ss:$16 sps:$4 sm:$0xff]  }
 0x1ce   : > { %v1388_v27 = vpack.c.bf16 %v1362_v19, %v1361_v16  ;;  %v3740_v14 = vld [vmem:[%s5327_s3 + $0x248] ss:$16 sps:$4 sm:$0xff]  }
 0x1cf   : > { %v5108_v2 = vpop.permute.xlu0 %1536 }
 0x1d0   : > { %v3838_v20 = vpop.eup %3837  ;;  %2312 = vmatpush1.bf16.msra.mxu1 %v1388_v27  ;;  %v5116_v9 = vpop.permute.xlu1 %1541 }
 0x1d1   : > { %v3165_v23 = vadd.f32 -1.0, %v3838_v20  ;;  %2313 = vmatprep.subr.bf16.mxu1 %v3981_v4 }
 0x1d2   : > { %v3840_v11 = vpop.eup %3839 }
 0x1d3   : > { %v3166_v10 = vadd.f32 -1.0, %v3840_v11  ;;  %2209 = vmatmul.mubr.bf16.gmra.mrb[132].mxu0 %v3679_v15  ;;  %2289 = vmatmul.mubr.bf16.gmra.mrb[32].mxu1 %v3680_v22  ;;  %v1363_v29 = vsel %vm1163_vm5, %v1109_v58, %v3165_v23  ;;  %v3729_v58 = vld [vmem:[%s5327_s3 + $0x1ec] ss:$16 sps:$4 sm:$0xff]   ;;  %v5119_v12 = vpop.permute.xlu0 %1546 }
 0x1d4   : > { %2216 = vmatprep.mubr.bf16.mxu0 %v3681_v25  ;;  %3243 = vmatprep.mubr.msk.bf16.mxu1 %vm806_vm1, %v3685_v26  ;;  %v5124_v19 = vpop.permute.xlu1 %1551 }
 0x1d5   : > { %v1364_v1 = vsel %vm1164_vm6, %v1112_v57, %v3166_v10  ;;  %v3734_v57 = vld [vmem:[%s5327_s3 + $0x208] ss:$16 sps:$4 sm:$0xff]  }
 0x1d6   : > { %v1389_v4 = vpack.c.bf16 %v1364_v1, %v1363_v29 }
 0x1d7   : > { %v5126_v27 = vpop.permute.xlu0 %1556 }
 0x1d8   : > { %2314 = vmatpush1.bf16.msra.mxu1 %v1389_v4  ;;  %v5130_v22 = vpop.permute.xlu1 %1561 }
 0x1db   : > { %2217 = vmatmul.mubr.bf16.gmra.mrb[136].mxu0 %v3686_v38  ;;  %2330 = vmatmul.mubr.bf16.vlgmr.msra.gmra.mrb[36].mxu1 %v3683_v35  ;;  %v5134_v25 = vpop.permute.xlu0 %1566 }
 0x1dc   : > { %3244 = vmatprep.mubr.msk.bf16.mxu1 %vm806_vm1, %v3687_v30  ;;  %v5136_v11 = vpop.permute.xlu1 %1571 }
 0x1df   : > { %v5140_v29 = vpop.permute.xlu0 %1576 }
 0x1e0   : > { %v5144_v38 = vpop.permute.xlu1 %1581 }
 0x1e3   : > { %2338 = vmatmul.mubr.bf16.gmra.mrb[40].mxu1 %v3689_v32  ;;  %v5146_v30 = vpop.permute.xlu0 %1586 }
 0x1e4   : > { %3245 = vmatprep.mubr.msk.bf16.mxu1 %vm806_vm1, %v3690_v33 }
 0x1eb   : > { %2346 = vmatmul.mubr.bf16.gmra.mrb[44].mxu1 %v3692_v34 }
 0x1ec   : > { %3246 = vmatprep.mubr.msk.bf16.mxu1 %vm806_vm1, %v3693_v62 }
 0x1f3   : > { %2354 = vmatmul.mubr.bf16.gmra.mrb[48].mxu1 %v3695_v31  ;;  %v5152_v31 = vpop.permute.xlu1 %1591 }
 0x1f4   : > { %3247 = vmatprep.mubr.msk.bf16.mxu1 %vm806_vm1, %v3696_v18  ;;  %v5154_v18 = vpop.permute.xlu0 %1596 }
 0x1fb   : > { %2362 = vmatmul.mubr.bf16.gmra.mrb[52].mxu1 %v3698_v37 }
 0x1fc   : > { %3248 = vmatprep.mubr.msk.bf16.mxu1 %vm806_vm1, %v3699_v36 }
 0x203   : > { %2370 = vmatmul.mubr.bf16.gmra.mrb[56].mxu1 %v3701_v39  ;;  %v5158_v39 = vpop.permute.xlu1 %1601 }
 0x204   : > { %3249 = vmatprep.mubr.msk.bf16.mxu1 %vm806_vm1, %v3702_v41 }
 0x20b   : > { %2378 = vmatmul.mubr.bf16.gmra.mrb[60].mxu1 %v3704_v42  ;;  %v5162_v42 = vpop.permute.xlu0 %1606 }
 0x20c   : > { %3250 = vmatprep.mubr.msk.bf16.mxu1 %vm806_vm1, %v3705_v6 }
 0x213   : > { %2386 = vmatmul.mubr.bf16.gmra.mrb[64].mxu1 %v3707_v43  ;;  %v5164_v43 = vpop.permute.xlu1 %1611 }
 0x214   : > { %3251 = vmatprep.mubr.msk.bf16.mxu1 %vm806_vm1, %v3708_v17 }
 0x21b   : > { %2394 = vmatmul.mubr.bf16.gmra.mrb[68].mxu1 %v3710_v45  ;;  %v5168_v45 = vpop.permute.xlu0 %1616 }
 0x21c   : > { %3252 = vmatprep.mubr.msk.bf16.mxu1 %vm806_vm1, %v3711_v46 }
 0x223   : > { %2402 = vmatmul.mubr.bf16.gmra.mrb[72].mxu1 %v3713_v40 }
 0x224   : > { %3253 = vmatprep.mubr.msk.bf16.mxu1 %vm806_vm1, %v3714_v47 }
 0x22b   : > { %2410 = vmatmul.mubr.bf16.gmra.mrb[0].mxu1 %v3716_v48  ;;  %v5172_v48 = vpop.permute.xlu1 %1621 }
 0x22c   : > { %3254 = vmatprep.mubr.msk.bf16.mxu1 %vm806_vm1, %v3717_v61  ;;  %v5174_v61 = vpop.permute.xlu0 %1626 }
 0x233   : > { %2418 = vmatmul.mubr.bf16.gmra.mrb[4].mxu1 %v3719_v8 }
 0x234   : > { %3255 = vmatprep.mubr.msk.bf16.mxu1 %vm806_vm1, %v3720_v44 }
 0x23b   : > { %2426 = vmatmul.mubr.bf16.gmra.mrb[8].mxu1 %v3722_v49 }
 0x23c   : > { %3256 = vmatprep.mubr.msk.bf16.mxu1 %vm806_vm1, %v3723_v52 }
 0x243   : > { %2434 = vmatmul.mubr.bf16.gmra.mrb[12].mxu1 %v3725_v53  ;;  %v5180_v53 = vpop.permute.xlu1 %1631 }
 0x244   : > { %3257 = vmatprep.mubr.msk.bf16.mxu1 %vm806_vm1, %v3726_v54  ;;  %v5182_v54 = vpop.permute.xlu0 %1636 }
 0x24b   : > { %2442 = vmatmul.mubr.bf16.gmra.mrb[16].mxu1 %v3728_v24 }
 0x24c   : > { %3258 = vmatprep.mubr.msk.bf16.mxu1 %vm806_vm1, %v3729_v58 }
 0x253   : > { %2450 = vmatmul.mubr.bf16.gmra.mrb[20].mxu1 %v3731_v50  ;;  %v5186_v50 = vpop.permute.xlu1 %1641 }
 0x254   : > { %3259 = vmatprep.mubr.msk.bf16.mxu1 %vm806_vm1, %v3732_v63 }
 0x25b   : > { %2458 = vmatmul.mubr.bf16.gmra.mrb[24].mxu1 %v3734_v57  ;;  %v5190_v57 = vpop.permute.xlu0 %1646 }
 0x25c   : > { %3260 = vmatprep.mubr.msk.bf16.mxu1 %vm806_vm1, %v3735_v51 }
 0x263   : > { %2466 = vmatmul.mubr.bf16.gmra.mrb[28].mxu1 %v3737_v3  ;;  %v5192_v3 = vpop.permute.xlu1 %1651 }
 0x264   : > { %3261 = vmatprep.mubr.msk.bf16.mxu1 %vm806_vm1, %v3738_v5 }
 0x266   : > { %v2146_v28 = vpop.f32.mrb[100].mxu0 }
 0x267   : > { %v2148_v13 = vpop.f32.mrb[101].mxu0 }
 0x268   : > { %v2149_v7 = vpop.f32.mrb[102].mxu0  ;;  %v5196_v13 = vpop.permute.xlu0 %1656 }
 0x269   : > { %v2151_v16 = vpop.f32.mrb[103].mxu0  ;;  %5334 = vst [vmem:[#allocation7_spill] sm:$0xff] %v5196_v13 }
 0x26b   : > { %2474 = vmatmul.mubr.bf16.gmra.mrb[32].mxu1 %v3740_v14 }
 0x26e   : > { %v5128_v20 = vpop.f32.mrb[104].mxu0 }
 0x26f   : > { %v2156_v15 = vpop.f32.mrb[105].mxu0 }
 0x270   : > { %v5132_v23 = vpop.f32.mrb[106].mxu0 }
 0x271   : > { %v2159_v26 = vpop.f32.mrb[107].mxu0 }
 0x272   : > { %v5200_v26 = vpop.permute.xlu1 %1661 }
 0x273   : > { %5335 = vst [vmem:[#allocation8_spill] sm:$0xff] %v5200_v26 }
 0x276   : > { %v5138_v10 = vpop.f32.mrb[108].mxu0 }
 0x277   : > { %v2164_v1 = vpop.f32.mrb[109].mxu0 }
 0x278   : > { %v5142_v4 = vpop.f32.mrb[110].mxu0  ;;  %v5202_v1 = vpop.permute.xlu0 %1666 }
 0x279   : > { %v2167_v35 = vpop.f32.mrb[111].mxu0  ;;  %5336 = vst [vmem:[#allocation9_spill] sm:$0xff] %v5202_v1  ;;  %v5210_v1 = vpop.permute.xlu1 %1671 }
 0x27a   : > { %v2147_v35 = vadd.f32 %v2146_v28, %v5082_v59  ;;  %5337 = vst [vmem:[#allocation10_spill] sm:$0xff] %v5210_v1  ;;  %v2155_v59 = vadd.f32 %v5128_v20, %v5092_v21  ;;  %v2163_v20 = vadd.f32 %v5138_v10, %v5103_v55 }
 0x27c   : > { %v5214_v28 = vpop.permute.xlu0 %1676 }
 0x27d   : > { %5338 = vst [vmem:[#allocation11_spill] sm:$0xff] %v5214_v28 }
 0x27e   : > { %v5148_v32 = vpop.f32.mrb[112].mxu0 }
 0x27f   : > { %v2172_v33 = vpop.f32.mrb[113].mxu0 }
 0x280   : > { %v5150_v34 = vpop.f32.mrb[114].mxu0 }
 0x281   : > { %v2175_v62 = vpop.f32.mrb[115].mxu0 }
 0x286   : > { %v5156_v37 = vpop.f32.mrb[116].mxu0 }
 0x287   : > { %v2180_v36 = vpop.f32.mrb[117].mxu0 }
 0x288   : > { %v5160_v41 = vpop.f32.mrb[118].mxu0  ;;  %v2150_v36 = vadd.f32 %v2149_v7, %v5090_v60  ;;  %v2158_v7 = vadd.f32 %v5132_v23, %v5098_v0  ;;  %v2166_v23 = vadd.f32 %v5142_v4, %v5106_v56  ;;  %v2171_v56 = vadd.f32 %v5148_v32, %v5108_v2 }
 0x289   : > { %v2183_v6 = vpop.f32.mrb[119].mxu0 }
 0x28e   : > { %v5166_v17 = vpop.f32.mrb[120].mxu0 }
 0x28f   : > { %v2188_v46 = vpop.f32.mrb[121].mxu0 }
 0x290   : > { %v5170_v40 = vpop.f32.mrb[122].mxu0 }
 0x291   : > { %v2191_v47 = vpop.f32.mrb[123].mxu0 }
 0x296   : > { %v5176_v8 = vpop.f32.mrb[124].mxu0 }
 0x297   : > { %v2196_v44 = vpop.f32.mrb[125].mxu0 }
 0x298   : > { %v5178_v49 = vpop.f32.mrb[126].mxu0 }
 0x299   : > { %v2199_v52 = vpop.f32.mrb[127].mxu0 }
 0x29e   : > { %v5184_v24 = vpop.f32.mrb[128].mxu0 }
 0x29f   : > { %v2204_v58 = vpop.f32.mrb[129].mxu0 }
 0x2a0   : > { %v5188_v63 = vpop.f32.mrb[130].mxu0 }
 0x2a1   : > { %v2207_v51 = vpop.f32.mrb[131].mxu0 }
 0x2a6   : > { %v5194_v5 = vpop.f32.mrb[132].mxu0 }
 0x2a7   : > { %v2212_v14 = vpop.f32.mrb[133].mxu0 }
 0x2a8   : > { %v5198_v16 = vpop.f32.mrb[134].mxu0 }
 0x2a9   : > { %v2215_v15 = vpop.f32.mrb[135].mxu0 }
 0x2ae   : > { %v5205_v33 = vpop.f32.mrb[136].mxu0  ;;  %v2331_v62 = vpop.f32.mrb[36].mxu1 }
 0x2af   : > { %v2332_v6 = vadd.f32 %v2331_v62, %v2147_v35  ;;  %v2220_v46 = vpop.f32.mrb[137].mxu0  ;;  %v2333_v47 = vpop.f32.mrb[37].mxu1 }
 0x2b0   : > { %v5208_v44 = vpop.f32.mrb[138].mxu0  ;;  %v2334_v52 = vpop.f32.mrb[38].mxu1 }
 0x2b1   : > { %v2520_v58 = vmul.f32 1.442695, %v2332_v6  ;;  %v2335_v51 = vadd.f32 %v2334_v52, %v2150_v36  ;;  %v2336_v14 = vpop.f32.mrb[39].mxu1  ;;  %v2223_v15 = vpop.f32.mrb[139].mxu0  ;;  %vm2482_vm1 = vcmp.gt.f32.partialorder %v2332_v6, 0.0 }
 0x2b2   : > { %v5218_v14 = vpop.permute.xlu1 %1681  ;;  %v5220_v15 = vpop.permute.xlu0 %1686 }
 0x2b3   : > { %3841 = vpow2.f32 %v2520_v58  ;;  %v2522_v26 = vmul.f32 1.442695, %v2335_v51  ;;  %5339 = vst [vmem:[#allocation12_spill] sm:$0xff] %v5218_v14  ;;  %5340 = vst [vmem:[#allocation13_spill] sm:$0xff] %v5220_v15  ;;  %vm2483_vm7 = vcmp.gt.f32.partialorder %v2335_v51, 0.0 }
 0x2b5   : > { %3843 = vpow2.f32 %v2522_v26 }
 0x2b6   : > { %v2339_v60 = vpop.f32.mrb[40].mxu1  ;;  %v2713_v14 = vpop.permute.xlu1 %2712 }
 0x2b7   : > { %v2340_v35 = vadd.f32 %v2339_v60, %v2155_v59  ;;  %v2341_v62 = vpop.f32.mrb[41].mxu1  ;;  %v2718_v1 = vpop.permute.xlu0 %2717 }
 0x2b8   : > { %v2342_v46 = vpop.f32.mrb[42].mxu1 }
 0x2b9   : > { %v2524_v36 = vmul.f32 1.442695, %v2340_v35  ;;  %v2343_v47 = vadd.f32 %v2342_v46, %v2158_v7  ;;  %v2344_v52 = vpop.f32.mrb[43].mxu1  ;;  %vm2484_vm8 = vcmp.gt.f32.partialorder %v2340_v35, 0.0 }
 0x2bb   : > { %3845 = vpow2.f32 %v2524_v36  ;;  %v2526_v58 = vmul.f32 1.442695, %v2343_v47  ;;  %vm2485_vm9 = vcmp.gt.f32.partialorder %v2343_v47, 0.0  ;;  %v2728_v32 = vpop.permute.xlu0 %2727 }
 0x2bd   : > { %v3842_v21 = vpop.eup %3841  ;;  %3847 = vpow2.f32 %v2526_v58 }
 0x2be   : > { %v3262_v26 = vadd.f32 -1.0, %v3842_v21  ;;  %v2347_v28 = vpop.f32.mrb[44].mxu1 }
 0x2bf   : > { %v3844_v0 = vpop.eup %3843  ;;  %v2348_v59 = vadd.f32 %v2347_v28, %v2163_v20  ;;  %v2349_v60 = vpop.f32.mrb[45].mxu1 }
 0x2c0   : > { %v2634_v7 = vsel %vm2482_vm1, %v2332_v6, %v3262_v26  ;;  %v3263_v62 = vadd.f32 -1.0, %v3844_v0  ;;  %v2350_v46 = vpop.f32.mrb[46].mxu1  ;;  %v2174_v26 = vadd.f32 %v5150_v34, %v5116_v9  ;;  %v2179_v9 = vadd.f32 %v5156_v37, %v5119_v12  ;;  %v2738_v37 = vpop.permute.xlu0 %2737 }
 0x2c1   : > { %v2528_v36 = vmul.f32 1.442695, %v2348_v59  ;;  %v2351_v52 = vadd.f32 %v2350_v46, %v2166_v23  ;;  %v2352_v15 = vpop.f32.mrb[47].mxu1  ;;  %v2900_v10 = vmul.f32 %v2713_v14, %v2634_v7  ;;  %vm2486_vm10 = vcmp.gt.f32.partialorder %v2348_v59, 0.0 }
 0x2c2   : > { %v2635_v55 = vsel %vm2483_vm7, %v2335_v51, %v3263_v62  ;;  %v2723_v51 = vpop.permute.xlu1 %2722 }
 0x2c3   : > { %v2901_v58 = vmul.f32 %v2718_v1, %v2635_v55  ;;  %3849 = vpow2.f32 %v2528_v36  ;;  %v2530_v21 = vmul.f32 1.442695, %v2351_v52  ;;  %vm2487_vm11 = vcmp.gt.f32.partialorder %v2351_v52, 0.0 }
 0x2c5   : > { %v3846_v13 = vpop.eup %3845  ;;  %v2938_v4 = vadd.f32 %v2901_v58, %v2900_v10  ;;  %3851 = vpow2.f32 %v2530_v21 }
 0x2c6   : > { %v3264_v6 = vadd.f32 -1.0, %v3846_v13  ;;  %v2355_v28 = vpop.f32.mrb[48].mxu1 }
 0x2c7   : > { %v3848_v20 = vpop.eup %3847  ;;  %v2356_v15 = vadd.f32 %v2355_v28, %v2171_v56  ;;  %v2357_v0 = vpop.f32.mrb[49].mxu1  ;;  %v2182_v56 = vadd.f32 %v5160_v41, %v5124_v19  ;;  %v2187_v19 = vadd.f32 %v5166_v17, %v5126_v27 }
 0x2c8   : > { %v2636_v14 = vsel %vm2484_vm8, %v2340_v35, %v3264_v6  ;;  %v3265_v1 = vadd.f32 -1.0, %v3848_v20  ;;  %v2358_v23 = vpop.f32.mrb[50].mxu1  ;;  %v2748_v17 = vpop.permute.xlu0 %2747 }
 0x2c9   : > { %v2902_v60 = vmul.f32 %v2723_v51, %v2636_v14  ;;  %v2532_v7 = vmul.f32 1.442695, %v2356_v15  ;;  %v2359_v62 = vadd.f32 %v2358_v23, %v2174_v26  ;;  %v2360_v2 = vpop.f32.mrb[51].mxu1  ;;  %vm2488_vm12 = vcmp.gt.f32.partialorder %v2356_v15, 0.0 }
 0x2ca   : > { %v2637_v46 = vsel %vm2485_vm9, %v2343_v47, %v3265_v1  ;;  %v2733_v47 = vpop.permute.xlu1 %2732 }
 0x2cb   : > { %v2939_v13 = vadd.f32 %v2938_v4, %v2902_v60  ;;  %v2903_v36 = vmul.f32 %v2728_v32, %v2637_v46  ;;  %3853 = vpow2.f32 %v2532_v7  ;;  %v2534_v55 = vmul.f32 1.442695, %v2359_v62 }
 0x2cc   : > { %vm2489_vm13 = vcmp.gt.f32.partialorder %v2359_v62, 0.0 }
 0x2cd   : > { %v3850_v10 = vpop.eup %3849  ;;  %v2940_v34 = vadd.f32 %v2939_v13, %v2903_v36  ;;  %3855 = vpow2.f32 %v2534_v55 }
 0x2ce   : > { %v3266_v58 = vadd.f32 -1.0, %v3850_v10  ;;  %v2363_v35 = vpop.f32.mrb[52].mxu1  ;;  %v2743_v55 = vpop.permute.xlu1 %2742 }
 0x2cf   : > { %v3852_v21 = vpop.eup %3851  ;;  %v2364_v6 = vadd.f32 %v2363_v35, %v2179_v9  ;;  %v2365_v28 = vpop.f32.mrb[53].mxu1 }
 0x2d0   : > { %v2638_v4 = vsel %vm2486_vm10, %v2348_v59, %v3266_v58  ;;  %v3267_v20 = vadd.f32 -1.0, %v3852_v21  ;;  %v2366_v26 = vpop.f32.mrb[54].mxu1 }
 0x2d1   : > { %v2904_v0 = vmul.f32 %v2733_v47, %v2638_v4  ;;  %v2536_v51 = vmul.f32 1.442695, %v2364_v6  ;;  %v2367_v14 = vadd.f32 %v2366_v26, %v2182_v56  ;;  %v2368_v12 = vpop.f32.mrb[55].mxu1  ;;  %v2195_v26 = vadd.f32 %v5176_v8, %v5134_v25  ;;  %v2758_v8 = vpop.permute.xlu0 %2757 }
 0x2d2   : > { %v2639_v1 = vsel %vm2487_vm11, %v2351_v52, %v3267_v20  ;;  %v2190_v52 = vadd.f32 %v5170_v40, %v5130_v22  ;;  %vm2490_vm14 = vcmp.gt.f32.partialorder %v2364_v6, 0.0 }
 0x2d3   : > { %v2941_v23 = vadd.f32 %v2940_v34, %v2904_v0  ;;  %v2905_v60 = vmul.f32 %v2738_v37, %v2639_v1  ;;  %3857 = vpow2.f32 %v2536_v51  ;;  %v2538_v7 = vmul.f32 1.442695, %v2367_v14  ;;  %v2753_v37 = vpop.permute.xlu1 %2752 }
 0x2d4   : > { %v2198_v1 = vadd.f32 %v5178_v49, %v5136_v11  ;;  %vm2491_vm15 = vcmp.gt.f32.partialorder %v2367_v14, 0.0 }
 0x2d5   : > { %v3854_v2 = vpop.eup %3853  ;;  %v2942_v41 = vadd.f32 %v2941_v23, %v2905_v60  ;;  %3859 = vpow2.f32 %v2538_v7 }
 0x2d6   : > { %v3268_v32 = vadd.f32 -1.0, %v3854_v2  ;;  %v2371_v59 = vpop.f32.mrb[56].mxu1 }
 0x2d7   : > { %v2372_v46 = vadd.f32 %v2371_v59, %v2187_v19  ;;  %v2373_v13 = vpop.f32.mrb[57].mxu1  ;;  %v3856_v36 = vpop.eup %3855 }
 0x2d8   : > { %v2640_v10 = vsel %vm2488_vm12, %v2356_v15, %v3268_v32  ;;  %v2374_v9 = vpop.f32.mrb[58].mxu1  ;;  %v3269_v58 = vadd.f32 -1.0, %v3856_v36 }
 0x2d9   : > { %v2906_v34 = vmul.f32 %v2743_v55, %v2640_v10  ;;  %v2540_v35 = vmul.f32 1.442695, %v2372_v46  ;;  %v2376_v21 = vpop.f32.mrb[59].mxu1  ;;  %v2375_v27 = vadd.f32 %v2374_v9, %v2190_v52  ;;  %v2203_v55 = vadd.f32 %v5184_v24, %v5140_v29  ;;  %v2768_v24 = vpop.permute.xlu0 %2767 }
 0x2da   : > { %v2641_v28 = vsel %vm2489_vm13, %v2359_v62, %v3269_v58  ;;  %vm2492_vm0 = vcmp.gt.f32.partialorder %v2372_v46, 0.0  ;;  %v2206_v58 = vadd.f32 %v5188_v63, %v5144_v38 }
 0x2db   : > { %v2943_v56 = vadd.f32 %v2942_v41, %v2906_v34  ;;  %3861 = vpow2.f32 %v2540_v35  ;;  %v2907_v47 = vmul.f32 %v2748_v17, %v2641_v28  ;;  %v2542_v4 = vmul.f32 1.442695, %v2375_v27  ;;  %v2763_v34 = vpop.permute.xlu1 %2762 }
 0x2dc   : > { %vm2493_vm2 = vcmp.gt.f32.partialorder %v2375_v27, 0.0 }
 0x2dd   : > { %v3858_v20 = vpop.eup %3857  ;;  %v2944_v0 = vadd.f32 %v2943_v56, %v2907_v47  ;;  %3863 = vpow2.f32 %v2542_v4 }
 0x2de   : > { %v3270_v22 = vadd.f32 -1.0, %v3858_v20  ;;  %v2379_v40 = vpop.f32.mrb[60].mxu1 }
 0x2df   : > { %v2380_v15 = vadd.f32 %v2379_v40, %v2195_v26  ;;  %v2381_v51 = vpop.f32.mrb[61].mxu1  ;;  %v3860_v12 = vpop.eup %3859 }
 0x2e0   : > { %v2642_v62 = vsel %vm2490_vm14, %v2364_v6, %v3270_v22  ;;  %v2382_v23 = vpop.f32.mrb[62].mxu1  ;;  %v3271_v7 = vadd.f32 -1.0, %v3860_v12  ;;  %v2211_v22 = vadd.f32 %v5194_v5, %v5146_v30  ;;  %v2778_v5 = vpop.permute.xlu0 %2777 }
 0x2e1   : > { %v2908_v60 = vmul.f32 %v2753_v37, %v2642_v62  ;;  %v2544_v2 = vmul.f32 1.442695, %v2380_v15  ;;  %v2384_v19 = vpop.f32.mrb[63].mxu1  ;;  %v2383_v25 = vadd.f32 %v2382_v23, %v2198_v1  ;;  %vm2494_vm3 = vcmp.gt.f32.partialorder %v2380_v15, 0.0  ;;  %v2773_v37 = vpop.permute.xlu1 %2772 }
 0x2e2   : > { %v2643_v32 = vsel %vm2491_vm15, %v2367_v14, %v3271_v7  ;;  %v2214_v1 = vadd.f32 %v5198_v16, %v5152_v31 }
 0x2e3   : > { %v2945_v41 = vadd.f32 %v2944_v0, %v2908_v60  ;;  %3865 = vpow2.f32 %v2544_v2  ;;  %v2909_v59 = vmul.f32 %v2758_v8, %v2643_v32  ;;  %v2546_v13 = vmul.f32 1.442695, %v2383_v25 }
 0x2e4   : > { %vm2495_vm4 = vcmp.gt.f32.partialorder %v2383_v25, 0.0 }
 0x2e5   : > { %v3862_v36 = vpop.eup %3861  ;;  %v2946_v52 = vadd.f32 %v2945_v41, %v2909_v59  ;;  %3867 = vpow2.f32 %v2546_v13  ;;  %v2219_v13 = vadd.f32 %v5205_v33, %v5154_v18  ;;  %v2788_v33 = vpop.permute.xlu0 %2787 }
 0x2e6   : > { %v3272_v11 = vadd.f32 -1.0, %v3862_v36  ;;  %v2387_v49 = vpop.f32.mrb[64].mxu1 }
 0x2e7   : > { %v2388_v6 = vadd.f32 %v2387_v49, %v2203_v55  ;;  %v2389_v10 = vpop.f32.mrb[65].mxu1  ;;  %v3864_v9 = vpop.eup %3863  ;;  %v2222_v49 = vadd.f32 %v5208_v44, %v5158_v39 }
 0x2e8   : > { %v2644_v14 = vsel %vm2492_vm0, %v2372_v46, %v3272_v11  ;;  %v2390_v35 = vpop.f32.mrb[66].mxu1  ;;  %v3273_v17 = vadd.f32 -1.0, %v3864_v9  ;;  %v2783_v11 = vpop.permute.xlu1 %2782 }
 0x2e9   : > { %v2910_v21 = vmul.f32 %v2763_v34, %v2644_v14  ;;  %v2548_v56 = vmul.f32 1.442695, %v2388_v6  ;;  %v2392_v28 = vpop.f32.mrb[67].mxu1  ;;  %v2391_v29 = vadd.f32 %v2390_v35, %v2206_v58  ;;  %vm2496_vm5 = vcmp.gt.f32.partialorder %v2388_v6, 0.0 }
 0x2ea   : > { %v2645_v4 = vsel %vm2493_vm2, %v2375_v27, %v3273_v17 }
 0x2eb   : > { %v2947_v47 = vadd.f32 %v2946_v52, %v2910_v21  ;;  %3869 = vpow2.f32 %v2548_v56  ;;  %v2911_v20 = vmul.f32 %v2768_v24, %v2645_v4  ;;  %v2550_v26 = vmul.f32 1.442695, %v2391_v29 }
 0x2ec   : > { %vm2497_vm6 = vcmp.gt.f32.partialorder %v2391_v29, 0.0 }
 0x2ed   : > { %v3866_v0 = vpop.eup %3865  ;;  %v2948_v40 = vadd.f32 %v2947_v47, %v2911_v20  ;;  %3871 = vpow2.f32 %v2550_v26  ;;  %v2793_v20 = vpop.permute.xlu1 %2792 }
 0x2ee   : > { %v3274_v38 = vadd.f32 -1.0, %v3866_v0  ;;  %v2395_v63 = vpop.f32.mrb[68].mxu1 }
 0x2ef   : > { %v2396_v46 = vadd.f32 %v2395_v63, %v2211_v22  ;;  %v2397_v51 = vpop.f32.mrb[69].mxu1  ;;  %v3868_v12 = vpop.eup %3867 }
 0x2f0   : > { %v2646_v27 = vsel %vm2494_vm3, %v2380_v15, %v3274_v38  ;;  %v2398_v62 = vpop.f32.mrb[70].mxu1  ;;  %v3275_v60 = vadd.f32 -1.0, %v3868_v12  ;;  %v2798_v51 = vpop.permute.xlu0 %2797 }
 0x2f1   : > { %v2912_v23 = vmul.f32 %v2773_v37, %v2646_v27  ;;  %v2552_v7 = vmul.f32 1.442695, %v2396_v46  ;;  %v2400_v2 = vpop.f32.mrb[71].mxu1  ;;  %v2399_v30 = vadd.f32 %v2398_v62, %v2214_v1  ;;  %vm2498_vm1 = vcmp.gt.f32.partialorder %v2396_v46, 0.0 }
 0x2f2   : > { %v2647_v8 = vsel %vm2495_vm4, %v2383_v25, %v3275_v60 }
 0x2f3   : > { %v2949_v19 = vadd.f32 %v2948_v40, %v2912_v23  ;;  %3873 = vpow2.f32 %v2552_v7  ;;  %v2913_v41 = vmul.f32 %v2778_v5, %v2647_v8  ;;  %v2554_v32 = vmul.f32 1.442695, %v2399_v30  ;;  %v2803_v5 = vpop.permute.xlu1 %2802 }
 0x2f4   : > { %vm2499_vm7 = vcmp.gt.f32.partialorder %v2399_v30, 0.0 }
 0x2f5   : > { %v3870_v59 = vpop.eup %3869  ;;  %v2950_v36 = vadd.f32 %v2949_v19, %v2913_v41  ;;  %3875 = vpow2.f32 %v2554_v32 }
 0x2f6   : > { %v3276_v31 = vadd.f32 -1.0, %v3870_v59  ;;  %v2403_v16 = vpop.f32.mrb[72].mxu1 }
 0x2f7   : > { %v2404_v15 = vadd.f32 %v2403_v16, %v2219_v13  ;;  %v2405_v55 = vpop.f32.mrb[73].mxu1  ;;  %v3872_v52 = vpop.eup %3871 }
 0x2f8   : > { %v2648_v25 = vsel %vm2496_vm5, %v2388_v6, %v3276_v31  ;;  %v2406_v10 = vpop.f32.mrb[74].mxu1  ;;  %v3277_v34 = vadd.f32 -1.0, %v3872_v52  ;;  %v2808_v13 = vpop.permute.xlu0 %2807 }
 0x2f9   : > { %v2914_v9 = vmul.f32 %v2783_v11, %v2648_v25  ;;  %v2556_v58 = vmul.f32 1.442695, %v2404_v15  ;;  %v2408_v14 = vpop.f32.mrb[75].mxu1  ;;  %v2407_v18 = vadd.f32 %v2406_v10, %v2222_v49  ;;  %vm2500_vm8 = vcmp.gt.f32.partialorder %v2404_v15, 0.0 }
 0x2fa   : > { %v2649_v21 = vsel %vm2497_vm6, %v2391_v29, %v3277_v34 }
 0x2fb   : > { %v2951_v35 = vadd.f32 %v2950_v36, %v2914_v9  ;;  %3877 = vpow2.f32 %v2556_v58  ;;  %v2915_v17 = vmul.f32 %v2788_v33, %v2649_v21  ;;  %v2558_v56 = vmul.f32 1.442695, %v2407_v18  ;;  %v2813_v9 = vpop.permute.xlu1 %2812 }
 0x2fc   : > { %vm2501_vm9 = vcmp.gt.f32.partialorder %v2407_v18, 0.0  ;;  %v2818_v21 = vpop.permute.xlu0 %2817 }
 0x2fd   : > { %v3874_v28 = vpop.eup %3873  ;;  %v2952_v24 = vadd.f32 %v2951_v35, %v2915_v17  ;;  %3879 = vpow2.f32 %v2558_v56 }
 0x2fe   : > { %v3278_v47 = vadd.f32 -1.0, %v3874_v28  ;;  %v2411_v4 = vpop.f32.mrb[0].mxu1 }
 0x2ff   : > { %v3503_v39 = vadd.f32 %v2411_v4, %v5162_v42  ;;  %v2413_v44 = vpop.f32.mrb[1].mxu1  ;;  %v3876_v6 = vpop.eup %3875 }
 0x300   : > { %v2650_v26 = vsel %vm2498_vm1, %v2396_v46, %v3278_v47  ;;  %v2414_v0 = vpop.f32.mrb[2].mxu1  ;;  %v3279_v40 = vadd.f32 -1.0, %v3876_v6 }
 0x301   : > { %v2916_v22 = vmul.f32 %v2793_v20, %v2650_v26  ;;  %v2560_v38 = vmul.f32 1.442695, %v3503_v39  ;;  %v2416_v29 = vpop.f32.mrb[3].mxu1  ;;  %v3504_v63 = vadd.f32 %v2414_v0, %v5164_v43  ;;  %vm2502_vm10 = vcmp.gt.f32.partialorder %v3503_v39, 0.0  ;;  %v2823_v26 = vpop.permute.xlu1 %2822 }
 0x302   : > { %v2651_v37 = vsel %vm2499_vm7, %v2399_v30, %v3279_v40 }
 0x303   : > { %v2953_v12 = vadd.f32 %v2952_v24, %v2916_v22  ;;  %3881 = vpow2.f32 %v2560_v38  ;;  %v2917_v1 = vmul.f32 %v2798_v51, %v2651_v37  ;;  %v2562_v27 = vmul.f32 1.442695, %v3504_v63  ;;  %v2828_v51 = vpop.permute.xlu0 %2827 }
 0x304   : > { %vm2503_vm11 = vcmp.gt.f32.partialorder %v3504_v63, 0.0 }
 0x305   : > { %v3878_v62 = vpop.eup %3877  ;;  %v2954_v42 = vadd.f32 %v2953_v12, %v2917_v1  ;;  %3883 = vpow2.f32 %v2562_v27 }
 0x306   : > { %v3280_v23 = vadd.f32 -1.0, %v3878_v62  ;;  %v2419_v60 = vpop.f32.mrb[4].mxu1 }
 0x307   : > { %v3505_v46 = vadd.f32 %v2419_v60, %v5168_v45  ;;  %v2421_v7 = vpop.f32.mrb[5].mxu1  ;;  %v3880_v2 = vpop.eup %3879 }
 0x308   : > { %v2652_v19 = vsel %vm2500_vm8, %v2404_v15, %v3280_v23  ;;  %v2422_v8 = vpop.f32.mrb[6].mxu1  ;;  %v3281_v41 = vadd.f32 -1.0, %v3880_v2  ;;  %v2833_v2 = vpop.permute.xlu1 %2832 }
 0x309   : > { %v2918_v43 = vmul.f32 %v2803_v5, %v2652_v19  ;;  %v2564_v32 = vmul.f32 1.442695, %v3505_v46  ;;  %v2424_v30 = vpop.f32.mrb[7].mxu1  ;;  %v3506_v59 = vadd.f32 %v2422_v8, %v5172_v48  ;;  %vm2504_vm12 = vcmp.gt.f32.partialorder %v3505_v46, 0.0 }
 0x30a   : > { %v2653_v31 = vsel %vm2501_vm9, %v2407_v18, %v3281_v41  ;;  %v2838_v30 = vpop.permute.xlu0 %2837 }
 0x30b   : > { %v2955_v36 = vadd.f32 %v2954_v42, %v2918_v43  ;;  %3885 = vpow2.f32 %v2564_v32  ;;  %v2919_v16 = vmul.f32 %v2808_v13, %v2653_v31  ;;  %v2566_v55 = vmul.f32 1.442695, %v3506_v59 }
 0x30c   : > { %vm2505_vm13 = vcmp.gt.f32.partialorder %v3506_v59, 0.0 }
 0x30d   : > { %v3882_v52 = vpop.eup %3881  ;;  %v2956_v45 = vadd.f32 %v2955_v36, %v2919_v16  ;;  %3887 = vpow2.f32 %v2566_v55 }
 0x30e   : > { %v3282_v11 = vadd.f32 -1.0, %v3882_v52  ;;  %v2427_v49 = vpop.f32.mrb[8].mxu1 }
 0x30f   : > { %v3507_v15 = vadd.f32 %v2427_v49, %v5174_v61  ;;  %v2429_v25 = vpop.f32.mrb[9].mxu1  ;;  %v3884_v10 = vpop.eup %3883 }
 0x310   : > { %v2654_v34 = vsel %vm2502_vm10, %v3503_v39, %v3282_v11  ;;  %v2430_v58 = vpop.f32.mrb[10].mxu1  ;;  %v3283_v14 = vadd.f32 -1.0, %v3884_v10  ;;  %v5341_v11 = vld [vmem:[#allocation7_spill] sm:$0xff] }
 0x311   : > { %v2920_v48 = vmul.f32 %v2813_v9, %v2654_v34  ;;  %v2568_v33 = vmul.f32 1.442695, %v3507_v15  ;;  %v2432_v18 = vpop.f32.mrb[11].mxu1  ;;  %v3508_v35 = vadd.f32 %v2430_v58, %v5180_v53  ;;  %vm2506_vm14 = vcmp.gt.f32.partialorder %v3507_v15, 0.0 }
 0x312   : > { %v2655_v56 = vsel %vm2503_vm11, %v3504_v63, %v3283_v14  ;;  %v2848_v14 = vpop.permute.xlu0 %2847 }
 0x313   : > { %v2957_v17 = vadd.f32 %v2956_v45, %v2920_v48  ;;  %3889 = vpow2.f32 %v2568_v33  ;;  %v2921_v28 = vmul.f32 %v2818_v21, %v2655_v56  ;;  %v2570_v24 = vmul.f32 1.442695, %v3508_v35  ;;  %v2843_v45 = vpop.permute.xlu1 %2842  ;;  %v5342_v33 = vld [vmem:[#allocation8_spill] sm:$0xff] }
 0x314   : > { %vm2507_vm15 = vcmp.gt.f32.partialorder %v3508_v35, 0.0 }
 0x315   : > { %v3886_v47 = vpop.eup %3885  ;;  %v2958_v61 = vadd.f32 %v2957_v17, %v2921_v28  ;;  %3891 = vpow2.f32 %v2570_v24 }
 0x316   : > { %v3284_v4 = vadd.f32 -1.0, %v3886_v47  ;;  %v2435_v44 = vpop.f32.mrb[12].mxu1 }
 0x317   : > { %v3509_v39 = vadd.f32 %v2435_v44, %v5182_v54  ;;  %v2437_v6 = vpop.f32.mrb[13].mxu1  ;;  %v3888_v20 = vpop.eup %3887  ;;  %v5343_v44 = vld [vmem:[#allocation9_spill] sm:$0xff] }
 0x318   : > { %v2656_v0 = vsel %vm2504_vm12, %v3505_v46, %v3284_v4  ;;  %v2438_v22 = vpop.f32.mrb[14].mxu1  ;;  %v3285_v40 = vadd.f32 -1.0, %v3888_v20  ;;  %v5266_v24 = vpop.permute.xlu1 %1691 }
 0x319   : > { %v2922_v53 = vmul.f32 %v2823_v26, %v2656_v0  ;;  %v2572_v38 = vmul.f32 1.442695, %v3509_v39  ;;  %v2440_v29 = vpop.f32.mrb[15].mxu1  ;;  %v3510_v63 = vadd.f32 %v2438_v22, %v5186_v50  ;;  %vm2508_vm0 = vcmp.gt.f32.partialorder %v3509_v39, 0.0  ;;  %v2853_v26 = vpop.permute.xlu0 %2852 }
 0x31a   : > { %v2657_v37 = vsel %vm2505_vm13, %v3506_v59, %v3285_v40 }
 0x31b   : > { %v2959_v12 = vadd.f32 %v2958_v61, %v2922_v53  ;;  %3893 = vpow2.f32 %v2572_v38  ;;  %v2923_v1 = vmul.f32 %v2828_v51, %v2657_v37  ;;  %v2574_v27 = vmul.f32 1.442695, %v3510_v63 }
 0x31c   : > { %vm2509_vm2 = vcmp.gt.f32.partialorder %v3510_v63, 0.0 }
 0x31d   : > { %v3890_v62 = vpop.eup %3889  ;;  %v2960_v54 = vadd.f32 %v2959_v12, %v2923_v1  ;;  %3895 = vpow2.f32 %v2574_v27  ;;  %v2858_v12 = vpop.permute.xlu1 %2857 }
 0x31e   : > { %v3286_v42 = vadd.f32 -1.0, %v3890_v62  ;;  %v2443_v23 = vpop.f32.mrb[16].mxu1 }
 0x31f   : > { %v3511_v60 = vadd.f32 %v2443_v23, %v5190_v57  ;;  %v2445_v46 = vpop.f32.mrb[17].mxu1  ;;  %v3892_v7 = vpop.eup %3891 }
 0x320   : > { %v2658_v5 = vsel %vm2506_vm14, %v3507_v15, %v3286_v42  ;;  %v2446_v19 = vpop.f32.mrb[18].mxu1  ;;  %v3287_v8 = vadd.f32 -1.0, %v3892_v7 }
 0x321   : > { %v2924_v50 = vmul.f32 %v2833_v2, %v2658_v5  ;;  %v2576_v43 = vmul.f32 1.442695, %v3511_v60  ;;  %v2448_v41 = vpop.f32.mrb[19].mxu1  ;;  %v3512_v32 = vadd.f32 %v2446_v19, %v5192_v3  ;;  %vm2510_vm3 = vcmp.gt.f32.partialorder %v3511_v60, 0.0  ;;  %v2863_v19 = vpop.permute.xlu0 %2862 }
 0x322   : > { %v2659_v13 = vsel %vm2507_vm15, %v3508_v35, %v3287_v8 }
 0x323   : > { %v2961_v59 = vadd.f32 %v2960_v54, %v2924_v50  ;;  %3897 = vpow2.f32 %v2576_v43  ;;  %v2925_v36 = vmul.f32 %v2838_v30, %v2659_v13  ;;  %v2578_v31 = vmul.f32 1.442695, %v3512_v32 }
 0x324   : > { %vm2511_vm4 = vcmp.gt.f32.partialorder %v3512_v32, 0.0 }
 0x325   : > { %v3894_v16 = vpop.eup %3893  ;;  %v2962_v57 = vadd.f32 %v2961_v59, %v2925_v36  ;;  %3899 = vpow2.f32 %v2578_v31  ;;  %v5346_v59 = vld [vmem:[#allocation12_spill] sm:$0xff]  ;;  %v2868_v36 = vpop.permute.xlu1 %2867 }
 0x326   : > { %v3288_v55 = vadd.f32 -1.0, %v3894_v16  ;;  %v2451_v52 = vpop.f32.mrb[20].mxu1 }
 0x327   : > { %v3513_v49 = vadd.f32 %v2451_v52, %v5341_v11  ;;  %v2453_v15 = vpop.f32.mrb[21].mxu1  ;;  %v3896_v25 = vpop.eup %3895 }
 0x328   : > { %v2660_v10 = vsel %vm2508_vm0, %v3509_v39, %v3288_v55  ;;  %v2454_v9 = vpop.f32.mrb[22].mxu1  ;;  %v3289_v34 = vadd.f32 -1.0, %v3896_v25 }
 0x329   : > { %v2926_v3 = vmul.f32 %v2843_v45, %v2660_v10  ;;  %v2580_v58 = vmul.f32 1.442695, %v3513_v49  ;;  %v2456_v48 = vpop.f32.mrb[23].mxu1  ;;  %v3514_v18 = vadd.f32 %v2454_v9, %v5342_v33  ;;  %vm2512_vm5 = vcmp.gt.f32.partialorder %v3513_v49, 0.0 }
 0x32a   : > { %v2661_v21 = vsel %vm2509_vm2, %v3510_v63, %v3289_v34  ;;  %v5344_v63 = vld [vmem:[#allocation10_spill] sm:$0xff] }
 0x32b   : > { %v2963_v35 = vadd.f32 %v2962_v57, %v2926_v3  ;;  %3901 = vpow2.f32 %v2580_v58  ;;  %v2927_v17 = vmul.f32 %v2848_v14, %v2661_v21  ;;  %v2582_v56 = vmul.f32 1.442695, %v3514_v18  ;;  %v2873_v3 = vpop.permute.xlu0 %2872  ;;  %v2878_v21 = vpop.permute.xlu1 %2877 }
 0x32c   : > { %vm2513_vm6 = vcmp.gt.f32.partialorder %v3514_v18, 0.0 }
 0x32d   : > { %v3898_v28 = vpop.eup %3897  ;;  %v2964_v47 = vadd.f32 %v2963_v35, %v2927_v17  ;;  %3903 = vpow2.f32 %v2582_v56 }
 0x32e   : > { %v3290_v61 = vadd.f32 -1.0, %v3898_v28  ;;  %v2459_v4 = vpop.f32.mrb[24].mxu1 }
 0x32f   : > { %v3515_v39 = vadd.f32 %v2459_v4, %v5343_v44  ;;  %v2461_v6 = vpop.f32.mrb[25].mxu1  ;;  %v3900_v20 = vpop.eup %3899 }
 0x330   : > { %v2662_v0 = vsel %vm2510_vm3, %v3511_v60, %v3290_v61  ;;  %v2462_v22 = vpop.f32.mrb[26].mxu1  ;;  %v3291_v40 = vadd.f32 -1.0, %v3900_v20  ;;  %v5345_v60 = vld [vmem:[#allocation11_spill] sm:$0xff]  ;;  %v2883_v6 = vpop.permute.xlu0 %2882 }
 0x331   : > { %v2928_v53 = vmul.f32 %v2853_v26, %v2662_v0  ;;  %v2584_v38 = vmul.f32 1.442695, %v3515_v39  ;;  %v2464_v29 = vpop.f32.mrb[27].mxu1  ;;  %v3516_v51 = vadd.f32 %v2462_v22, %v5344_v63  ;;  %vm2514_vm1 = vcmp.gt.f32.partialorder %v3515_v39, 0.0  ;;  %v2888_v22 = vpop.permute.xlu1 %2887 }
 0x332   : > { %v2663_v1 = vsel %vm2511_vm4, %v3512_v32, %v3291_v40 }
 0x333   : > { %v2965_v37 = vadd.f32 %v2964_v47, %v2928_v53  ;;  %3905 = vpow2.f32 %v2584_v38  ;;  %v2929_v27 = vmul.f32 %v2858_v12, %v2663_v1  ;;  %v2586_v62 = vmul.f32 1.442695, %v3516_v51 }
 0x334   : > { %vm2515_vm7 = vcmp.gt.f32.partialorder %v3516_v51, 0.0  ;;  %v2893_v12 = vpop.permute.xlu0 %2892 }
 0x335   : > { %v3902_v54 = vpop.eup %3901  ;;  %v2966_v42 = vadd.f32 %v2965_v37, %v2929_v27  ;;  %3907 = vpow2.f32 %v2586_v62  ;;  %v2898_v62 = vpop.permute.xlu1 %2897 }
 0x336   : > { %v3292_v23 = vadd.f32 -1.0, %v3902_v54  ;;  %v2467_v46 = vpop.f32.mrb[28].mxu1 }
 0x337   : > { %v3517_v7 = vadd.f32 %v2467_v46, %v5345_v60  ;;  %v2469_v2 = vpop.f32.mrb[29].mxu1  ;;  %v3904_v5 = vpop.eup %3903 }
 0x338   : > { %v2664_v50 = vsel %vm2512_vm5, %v3513_v49, %v3292_v23  ;;  %v2470_v8 = vpop.f32.mrb[30].mxu1  ;;  %v3293_v41 = vadd.f32 -1.0, %v3904_v5  ;;  %v5347_v49 = vld [vmem:[#allocation13_spill] sm:$0xff] }
 0x339   : > { %v2930_v43 = vmul.f32 %v2863_v19, %v2664_v50  ;;  %v2588_v30 = vmul.f32 1.442695, %v3517_v7  ;;  %v2472_v32 = vpop.f32.mrb[31].mxu1  ;;  %v3518_v13 = vadd.f32 %v2470_v8, %v5346_v59  ;;  %vm2516_vm8 = vcmp.gt.f32.partialorder %v3517_v7, 0.0 }
 0x33a   : > { %v2665_v16 = vsel %vm2513_vm6, %v3514_v18, %v3293_v41  ;;  %v2982_v50 = vstv %s2981_s15 }
 0x33b   : > { %v2967_v31 = vadd.f32 %v2966_v42, %v2930_v43  ;;  %3909 = vpow2.f32 %v2588_v30  ;;  %v2931_v57 = vmul.f32 %v2868_v36, %v2665_v16  ;;  %v2590_v55 = vmul.f32 1.442695, %v3518_v13 }
 0x33c   : > { %vm2517_vm9 = vcmp.gt.f32.partialorder %v3518_v13, 0.0 }
 0x33d   : > { %v3906_v52 = vpop.eup %3905  ;;  %v2968_v45 = vadd.f32 %v2967_v31, %v2931_v57  ;;  %3911 = vpow2.f32 %v2590_v55 }
 0x33e   : > { %v3294_v11 = vadd.f32 -1.0, %v3906_v52  ;;  %v2475_v15 = vpop.f32.mrb[32].mxu1 }
 0x33f   : > { %v3519_v25 = vadd.f32 %v2475_v15, %v5347_v49  ;;  %v2477_v10 = vpop.f32.mrb[33].mxu1  ;;  %v3908_v9 = vpop.eup %3907 }
 0x340   : > { %v2666_v34 = vsel %vm2514_vm1, %v3515_v39, %v3294_v11  ;;  %v2478_v58 = vpop.f32.mrb[34].mxu1  ;;  %v3295_v14 = vadd.f32 -1.0, %v3908_v9 }
 0x341   : > { %v2932_v48 = vmul.f32 %v2873_v3, %v2666_v34  ;;  %v2592_v33 = vmul.f32 1.442695, %v3519_v25  ;;  %v2480_v18 = vpop.f32.mrb[35].mxu1  ;;  %v3520_v35 = vadd.f32 %v2478_v58, %v5266_v24  ;;  %vm2518_vm10 = vcmp.gt.f32.partialorder %v3519_v25, 0.0 }
 0x342   : > { %v2667_v56 = vsel %vm2515_vm7, %v3516_v51, %v3295_v14 }
 0x343   : > { %v2969_v17 = vadd.f32 %v2968_v45, %v2932_v48  ;;  %3913 = vpow2.f32 %v2592_v33  ;;  %v2933_v28 = vmul.f32 %v2878_v21, %v2667_v56  ;;  %v2594_v47 = vmul.f32 1.442695, %v3520_v35 }
 0x344   : > { %vm2519_vm11 = vcmp.gt.f32.partialorder %v3520_v35, 0.0 }
 0x345   : > { %v3910_v61 = vpop.eup %3909  ;;  %v2970_v4 = vadd.f32 %v2969_v17, %v2933_v28  ;;  %3915 = vpow2.f32 %v2594_v47 }
 0x346   : > { %v3296_v44 = vadd.f32 -1.0, %v3910_v61 }
 0x347   : > { %v3912_v39 = vpop.eup %3911 }
 0x348   : > { %v2668_v20 = vsel %vm2516_vm8, %v3517_v7, %v3296_v44  ;;  %v3297_v0 = vadd.f32 -1.0, %v3912_v39 }
 0x349   : > { %v2934_v26 = vmul.f32 %v2883_v6, %v2668_v20 }
 0x34a   : > { %v2669_v24 = vsel %vm2517_vm9, %v3518_v13, %v3297_v0 }
 0x34b   : > { %v2971_v53 = vadd.f32 %v2970_v4, %v2934_v26  ;;  %v2935_v40 = vmul.f32 %v2888_v22, %v2669_v24 }
 0x34d   : > { %v3914_v38 = vpop.eup %3913  ;;  %v2972_v29 = vadd.f32 %v2971_v53, %v2935_v40 }
 0x34e   : > { %v3298_v63 = vadd.f32 -1.0, %v3914_v38 }
 0x34f   : > { %v3916_v51 = vpop.eup %3915 }
 0x350   : > { %v2670_v37 = vsel %vm2518_vm10, %v3519_v25, %v3298_v63  ;;  %v3299_v27 = vadd.f32 -1.0, %v3916_v51 }
 0x351   : > { %v2936_v1 = vmul.f32 %v2893_v12, %v2670_v37 }
 0x352   : > { %v2671_v42 = vsel %vm2519_vm11, %v3520_v35, %v3299_v27 }
 0x353   : > { %v2973_v54 = vadd.f32 %v2972_v29, %v2936_v1  ;;  %v2937_v23 = vmul.f32 %v2898_v62, %v2671_v42 }
 0x355   : > { %v2974_v46 = vadd.f32 %v2973_v54, %v2937_v23 }
 0x357   : > { %v2975_v60 = vrot.slane %v2974_v46, 4 }
 0x359   : > { %v2976_v7 = vadd.f32 %v2975_v60, %v2974_v46 }
 0x35b   : > { %v2977_v2 = vrot.slane %v2976_v7, 2 }
 0x35d   : > { %v2978_v5 = vadd.f32 %v2977_v2, %v2976_v7 }
 0x35f   : > { %v2979_v19 = vrot.slane %v2978_v5, 1 }
 0x361   : > { %v2980_v8 = vadd.f32 %v2979_v19, %v2978_v5 }
 0x363   : > { %v2983_v43 = vadd.f32 %v2982_v50, %v2980_v8 }
 0x365   : > { %2984 = vst [vmem:[%s321_s17] sm:$0x1] %v2983_v43 }
 0x366   : > { %3930 = shalt.err (!%p3927_p5)
}
 0x367   : > { %s3931_s25 = scalar_lea.hbm %s5280_s21, 16  ;;  %s3935_s14 = scalar_lea.hbm %s5331_s7, 32 }
 0x368   : > { %p3932_p7 = scmp.ne.s32.totalorder %s5280_s21, %s3931_s25  ;;  %p3936_p12 = scmp.lt.u32.totalorder %s5280_s21, %s5331_s7 }
 0x369   : > { %p3937_p13 = scmp.lt.u32.totalorder %s3935_s14, %s3931_s25  ;;  %p3939_p1 = scmp.lt.u32.totalorder %s3931_s25, %s5280_s21 }
 0x36a   : > { %p3933_p10 = pnand %p3932_p7, %p4066_p6 }
 0x36b   : > { %p3938_p0 = por %p3937_p13, %p3936_p12 }
 0x36c   : > { %p3934_p11 = pneg %p3933_p10 }
 0x36d   : > { %p3940_p2 = por %p3939_p1, %p3938_p0 }
 0x36f   : > { %p3941_p3 = pnand %p3940_p2, %p3934_p11 }
 0x371   : > { %3944 = shalt.err (!%p3941_p3)
}
 0x372   : > { %3557 = dma.vmem_to_hbm [thread:$0]  (%p4066_p6), %s5282_s18, 16, %s5280_s21, %s2986_s22  }
 0x373 PF: > { %s3010_s17 = sand.u32 1, %s3967_s26   ;;  %p3560_p4 = pnand %p3061_p9, %p4070_p8 }
 0x374   : > { %s3011_s19 = scalar_lea.sflag [#allocation5], %s3010_s17 }
 0x375   : > { %3962 = dma.done.wait (!%p3560_p4), %s3011_s19, 16  }
 0x376   : > { %3964 = vsyncadd (!%p3560_p4), %s3011_s19, 4294967280  ;;  %p18_p5 = scmp.ge.s32.totalorder %s4051_s8, 4   ;;  %s5348_s26 = smov %s3971_s27 }
 0x377   : > { %s5349_s27 = smov %s3975_s28  ;;  %s5350_s28 = smov %s4064_s11 }
 0x378   : > { %s5351_s29 = smov %s4051_s8  ;;  %20 = sbr.rel (!%p18_p5) target bundleno = 5 (0x5), region = 129 }
 0x37f   :  { %3015 = vsyncpa [#allocation5], 1 }
 0x380   :  { %3017 = vsyncpa [#allocation5 + $0x1], 1 }

</bundles_post_ra>
